<compile_context>
chip_gen: v7x
topology: tpu7x:2x2x1
jax: 0.10.0
libtpu: 0.0.40
codegen_flags: <defaults>
</compile_context>

<pallas_src>
import functools

import jax
import jax.numpy as jnp
from jax.experimental import pallas as pl
from jax.experimental.pallas import tpu as pltpu

EMBED_DIM = 32
NUM_HEADS = 4
HEAD_DIM = EMBED_DIM // NUM_HEADS
PATCH = (2, 4, 4)          # (pt, ph, pw) patch / stride of the 3D patch embed
MLP_RATIO = 4
EPS = 1e-5

# Row layout of the packed small-parameter slab (one (9,128) f32 array).
(_R_B_EMBED, _R_LN1_G, _R_LN1_B, _R_B_QKV, _R_B_PROJ,
 _R_LN2_G, _R_LN2_B, _R_B_FC1, _R_B_FC2) = range(9)
_SLAB_ROWS = 9
_SLAB_LANES = 128


def _layer_norm(x, gamma, beta):
    # Single-pass statistics: sum and sum-of-squares.
    inv_d = 1.0 / x.shape[-1]
    s1 = jnp.sum(x, axis=-1, keepdims=True)
    s2 = jnp.sum(x * x, axis=-1, keepdims=True)
    mu = s1 * inv_d
    var = s2 * inv_d - mu * mu
    return (x - mu) * jax.lax.rsqrt(var + EPS) * gamma + beta


# ---------------------------------------------------------------------------
# Fused kernel: patch-embed matmul + full Swin block.
# ---------------------------------------------------------------------------
def _video_swin_kernel(patches_ref, w_emb_ref, w_qkv_ref, w_proj_ref,
                       relb_ref, w_fc1_ref, w_fc2_ref, vec_ref,
                       o_ref, *, batch, tokens):
    D, NH, DH = EMBED_DIM, NUM_HEADS, HEAD_DIM
    Dm = MLP_RATIO * D
    B, L = batch, tokens
    G = B * NH                     # fused (batch, head) batch dimension
    N = B * L                      # total token rows

    # -- packed small parameters: one DMA, cheap row/lane slices -------------
    vec = vec_ref[...]                                            # (9, 128)
    b_embed = vec[_R_B_EMBED:_R_B_EMBED + 1, :D]
    ln1_g   = vec[_R_LN1_G:_R_LN1_G + 1, :D]
    ln1_b   = vec[_R_LN1_B:_R_LN1_B + 1, :D]
    b_qkv   = vec[_R_B_QKV:_R_B_QKV + 1, :3 * D]
    b_proj  = vec[_R_B_PROJ:_R_B_PROJ + 1, :D]
    ln2_g   = vec[_R_LN2_G:_R_LN2_G + 1, :D]
    ln2_b   = vec[_R_LN2_B:_R_LN2_B + 1, :D]
    b_fc1   = vec[_R_B_FC1:_R_B_FC1 + 1, :Dm]
    b_fc2   = vec[_R_B_FC2:_R_B_FC2 + 1, :D]

    # -- 1) 3D patch embedding: one MXU matmul --------------------------------
    tok = jnp.dot(patches_ref[...], w_emb_ref[...],
                  preferred_element_type=jnp.float32) + b_embed       # (N, D)

    # -- 2) LayerNorm 1 --------------------------------------------------------
    xn = _layer_norm(tok, ln1_g, ln1_b)                               # (N, D)

    # -- 3) W-MSA: fused QKV projection (1/sqrt(DH) folded into weights) ------
    qkv = jnp.dot(xn, w_qkv_ref[...],
                  preferred_element_type=jnp.float32) + b_qkv         # (N, 3D)

    def split_heads(off):
        # Lane-slice the NH heads, stack on a new major axis, split the batch
        # off the sublane axis -> (B*NH, L, DH).  All reshapes/transposes after
        # the DH-wide slices touch only leading (major) dims.
        hs = [qkv[:, off + h * DH: off + (h + 1) * DH] for h in range(NH)]
        s = jnp.stack(hs, axis=0)                                     # (NH,N,DH)
        return s.reshape(NH, B, L, DH).transpose(1, 0, 2, 3).reshape(G, L, DH)

    q = split_heads(0)
    k = split_heads(D)
    v = split_heads(2 * D)

    s = jnp.einsum('gqd,gkd->gqk', q, k,
                   preferred_element_type=jnp.float32)                # (G, L, L)
    # Relative-position bias: broadcast only along the leading batch dim.
    s = (s.reshape(B, NH, L, L) + relb_ref[...][None]).reshape(G, L, L)

    m = jnp.max(s, axis=-1, keepdims=True)
    p = jnp.exp(s - m)
    denom = jnp.sum(p, axis=-1, keepdims=True)
    p = p * pl.reciprocal(denom, approx=True)    # EUP reciprocal (VPU freed)
    ctx = jnp.einsum('gqk,gkd->gqd', p, v,
                     preferred_element_type=jnp.float32)              # (G,L,DH)

    # Head merge folded into a single K=NH*DH=32 output projection.
    ctx4 = ctx.reshape(B, NH, L, DH)
    ctx_cat = jnp.concatenate([ctx4[:, h] for h in range(NH)],
                              axis=-1).reshape(N, D)                  # (N, D)
    attn = jnp.dot(ctx_cat, w_proj_ref[...],
                   preferred_element_type=jnp.float32) + b_proj

    x1 = tok + attn                              # residual 1

    # -- 4) LayerNorm 2 + MLP --------------------------------------------------
    xn2 = _layer_norm(x1, ln2_g, ln2_b)
    hmid = jnp.dot(xn2, w_fc1_ref[...],
                   preferred_element_type=jnp.float32) + b_fc1
    # TODO(synk): PyTorch nn.GELU defaults to exact erf-GELU; tanh approximation
    # is used here for guaranteed Mosaic lowering.
    hmid = jax.nn.gelu(hmid, approximate=True)
    hout = jnp.dot(hmid, w_fc2_ref[...],
                   preferred_element_type=jnp.float32) + b_fc2

    # TODO(synk): at larger N*D, present a lane-dense (N*D/128, 128) output
    # slab instead of this 32-lane-wide block to avoid masked partial stores.
    o_ref[...] = x1 + hout                       # residual 2, (N, D)


def _fused_backbone(patches, kernel_args, batch, tokens, *, batch_grid=False):
    n = patches.shape[0]
    if not batch_grid:
        # Single kernel invocation, whole batch: optimal on 1-TC v5e/v6e (no
        # grid-step overhead, every weight DMA'd exactly once); the working
        # set (<150 KiB) trivially fits VMEM on every generation.
        kernel = functools.partial(_video_swin_kernel,
                                   batch=batch, tokens=tokens)
        return pl.pallas_call(
            kernel,
            out_shape=jax.ShapeDtypeStruct((n, EMBED_DIM), jnp.float32),
        )(patches, *kernel_args)

    # v7x path: one batch element per step on a "parallel" grid axis so both
    # TensorCores get work.  Weights / bias slab use a constant index_map.
    kernel = functools.partial(_video_swin_kernel, batch=1, tokens=tokens)
    w_emb, w_qkv, w_proj, relb, w_fc1, w_fc2, vec = kernel_args
    const2 = lambda b: (0, 0)
    const3 = lambda b: (0, 0, 0)
    return pl.pallas_call(
        kernel,
        grid=(batch,),
        in_specs=[
            pl.BlockSpec((tokens, patches.shape[1]), lambda b: (b, 0)),
            pl.BlockSpec(w_emb.shape, const2),
            pl.BlockSpec(w_qkv.shape, const2),
            pl.BlockSpec(w_proj.shape, const2),
            pl.BlockSpec(relb.shape, const3),
            pl.BlockSpec(w_fc1.shape, const2),
            pl.BlockSpec(w_fc2.shape, const2),
            pl.BlockSpec(vec.shape, const2),
        ],
        out_specs=pl.BlockSpec((tokens, EMBED_DIM), lambda b: (b, 0)),
        out_shape=jax.ShapeDtypeStruct((n, EMBED_DIM), jnp.float32),
        compiler_params=pltpu.CompilerParams(
            dimension_semantics=("parallel",)),
    )(patches, *kernel_args)


# ---------------------------------------------------------------------------
# Parameters (deterministic, synthetic) and one-time parameter prep
# ---------------------------------------------------------------------------
def _relative_position_index(nT, nH, nW):
    coords = jnp.stack(jnp.meshgrid(jnp.arange(nT), jnp.arange(nH),
                                    jnp.arange(nW), indexing="ij"))   # (3,T,H,W)
    coords = coords.reshape(3, -1)                                    # (3, L)
    rel = coords[:, :, None] - coords[:, None, :]                     # (3, L, L)
    rel = rel.transpose(1, 2, 0) + jnp.array([nT - 1, nH - 1, nW - 1])
    strides = jnp.array([(2 * nH - 1) * (2 * nW - 1), 2 * nW - 1, 1])
    return jnp.sum(rel * strides, axis=-1).astype(jnp.int32)          # (L, L)


def init_params(key, in_chans, window):
    D = EMBED_DIM
    NH = NUM_HEADS
    nT, nH, nW = window
    pd = in_chans * PATCH[0] * PATCH[1] * PATCH[2]
    Dm = MLP_RATIO * D
    n_rel = (2 * nT - 1) * (2 * nH - 1) * (2 * nW - 1)
    ks = jax.random.split(key, 8)
    s = 0.02
    return {
        "w_embed": s * jax.random.normal(ks[0], (pd, D), jnp.float32),
        "b_embed": jnp.zeros((D,), jnp.float32),
        "ln1_g": jnp.ones((D,), jnp.float32),
        "ln1_b": jnp.zeros((D,), jnp.float32),
        "w_qkv": s * jax.random.normal(ks[1], (D, 3 * D), jnp.float32),
        "b_qkv": jnp.zeros((3 * D,), jnp.float32),
        "w_proj": s * jax.random.normal(ks[2], (D, D), jnp.float32),
        "b_proj": jnp.zeros((D,), jnp.float32),
        "rel_table": s * jax.random.normal(ks[3], (n_rel, NH), jnp.float32),
        "ln2_g": jnp.ones((D,), jnp.float32),
        "ln2_b": jnp.zeros((D,), jnp.float32),
        "w_fc1": s * jax.random.normal(ks[4], (D, Dm), jnp.float32),
        "b_fc1": jnp.zeros((Dm,), jnp.float32),
        "w_fc2": s * jax.random.normal(ks[5], (Dm, D), jnp.float32),
        "b_fc2": jnp.zeros((D,), jnp.float32),
    }


def _pack_vectors(vectors):
    rows = []
    for v in vectors:
        v = jnp.asarray(v, jnp.float32).reshape(-1)
        rows.append(jnp.zeros((_SLAB_LANES,), jnp.float32)
                    .at[:v.shape[0]].set(v))
    return jnp.stack(rows, axis=0)                       # (n_rows, 128)


def prepare_kernel_params(params, window):
    """One-time parameter prep, hoisted out of the per-call forward path."""
    D = EMBED_DIM
    NH = NUM_HEADS
    nT, nH, nW = window
    L = nT * nH * nW
    scale = 1.0 / (HEAD_DIM ** 0.5)

    # Fold the attention scale into the Q slice of the fused QKV weights/bias.
    w_qkv = jnp.concatenate(
        [params["w_qkv"][:, :D] * scale, params["w_qkv"][:, D:]], axis=1)
    b_qkv = jnp.concatenate(
        [params["b_qkv"][:D] * scale, params["b_qkv"][D:]], axis=0)

    # Dense relative-position bias (NH, L, L), computed once per model.
    rel_index = _relative_position_index(nT, nH, nW)
    rel_bias = jnp.take(params["rel_table"], rel_index.reshape(-1), axis=0)
    rel_bias = rel_bias.reshape(L, L, NH).transpose(2, 0, 1)

    # All small vectors packed into one (9, 128) slab -> a single kernel DMA.
    vec_slab = _pack_vectors([
        params["b_embed"], params["ln1_g"], params["ln1_b"],
        b_qkv, params["b_proj"], params["ln2_g"], params["ln2_b"],
        params["b_fc1"], params["b_fc2"],
    ])
    assert vec_slab.shape == (_SLAB_ROWS, _SLAB_LANES)

    return {
        "w_embed": params["w_embed"],
        "w_qkv": w_qkv,
        "w_proj": params["w_proj"],
        "rel_bias": rel_bias,
        "w_fc1": params["w_fc1"],
        "w_fc2": params["w_fc2"],
        "vec_slab": vec_slab,
    }


def my_video_swin_forward(x, kparams, *, batch_grid=False):
    # x: (B, C, T, H, W) -- NCDHW, like the PyTorch backbone input.
    B, C, T, H, W = x.shape
    pt, ph, pw = PATCH
    nT, nH, nW = T // pt, H // ph, W // pw
    L = nT * nH * nW
    D = EMBED_DIM

    # Conv3d(kernel==stride) == non-overlapping patch flatten + linear proj.
    # Patch vector ordering matches PyTorch conv weight layout (C, kt, kh, kw).
    # TODO(synk): at real video sizes, fold this extraction into the kernel's
    # DMA (BlockSpec over NCDHW / in-kernel async-copy gather) instead of
    # materializing the transpose in HBM (matters most on bandwidth-poor v5e).
    patches = x.reshape(B, C, nT, pt, nH, ph, nW, pw)
    patches = patches.transpose(0, 2, 4, 6, 1, 3, 5, 7)
    patches = patches.reshape(B * L, C * pt * ph * pw)

    kernel_args = (
        kparams["w_embed"], kparams["w_qkv"], kparams["w_proj"],
        kparams["rel_bias"], kparams["w_fc1"], kparams["w_fc2"],
        kparams["vec_slab"],
    )
    tok = _fused_backbone(patches, kernel_args, B, L,
                          batch_grid=batch_grid)                     # (B*L, D)

    # Return NCDHW feature map (B, D, T', H', W'), like a video-swin backbone.
    feat = tok.reshape(B, nT, nH, nW, D).transpose(0, 4, 1, 2, 3)
    return feat


if __name__ == "__main__":
    key = jax.random.PRNGKey(0)
    k_x, k_p = jax.random.split(key)

    B, C, T, H, W = 2, 3, 4, 16, 16
    x = jax.random.normal(k_x, (B, C, T, H, W), jnp.float32)

    pt, ph, pw = PATCH
    window = (T // pt, H // ph, W // pw)       # one window == all tokens here
    raw_params = init_params(k_p, C, window)
    kparams = prepare_kernel_params(raw_params, window)   # hoisted, once

    # Default gridless path (best for 1-TC v5e/v6e); pass batch_grid=True on
    # v7x to shard the batch over both TensorCores.
    out = jax.block_until_ready(my_video_swin_forward(x, kparams))
    assert out.shape == (B, EMBED_DIM, T // pt, H // ph, W // pw), out.shape
    assert bool(jnp.all(jnp.isfinite(out)))
    print("KERNEL_OK")
</pallas_src>

<mosaic_0001>
module attributes {stable_mosaic.version = 11 : i64} {
  func.func @_video_swin_kernel(%arg0: memref<64x96xf32, #tpu.memory_space<vmem>>, %arg1: memref<96x32xf32, #tpu.memory_space<vmem>>, %arg2: memref<32x96xf32, #tpu.memory_space<vmem>>, %arg3: memref<32x32xf32, #tpu.memory_space<vmem>>, %arg4: memref<4x32x32xf32, #tpu.memory_space<vmem>>, %arg5: memref<32x128xf32, #tpu.memory_space<vmem>>, %arg6: memref<128x32xf32, #tpu.memory_space<vmem>>, %arg7: memref<9x128xf32, #tpu.memory_space<vmem>>, %arg8: memref<64x32xf32, #tpu.memory_space<vmem>>) attributes {dimension_semantics = [], scalar_prefetch = 0 : i64, scratch_operands = 0 : i64, tpu.core_type = #tpu.core_type<tc>} {
    %c0 = arith.constant 0 : index
    %c0_0 = arith.constant 0 : index
    %0 = vector.load %arg7[%c0, %c0_0] : memref<9x128xf32, #tpu.memory_space<vmem>>, vector<9x128xf32>
    %1 = vector.extract_strided_slice %0 {offsets = [0, 0], sizes = [1, 32], strides = [1, 1]} : vector<9x128xf32> to vector<1x32xf32>
    %2 = vector.extract_strided_slice %0 {offsets = [1, 0], sizes = [1, 32], strides = [1, 1]} : vector<9x128xf32> to vector<1x32xf32>
    %3 = vector.extract_strided_slice %0 {offsets = [2, 0], sizes = [1, 32], strides = [1, 1]} : vector<9x128xf32> to vector<1x32xf32>
    %4 = vector.extract_strided_slice %0 {offsets = [3, 0], sizes = [1, 96], strides = [1, 1]} : vector<9x128xf32> to vector<1x96xf32>
    %5 = vector.extract_strided_slice %0 {offsets = [4, 0], sizes = [1, 32], strides = [1, 1]} : vector<9x128xf32> to vector<1x32xf32>
    %6 = vector.extract_strided_slice %0 {offsets = [5, 0], sizes = [1, 32], strides = [1, 1]} : vector<9x128xf32> to vector<1x32xf32>
    %7 = vector.extract_strided_slice %0 {offsets = [6, 0], sizes = [1, 32], strides = [1, 1]} : vector<9x128xf32> to vector<1x32xf32>
    %8 = vector.extract_strided_slice %0 {offsets = [7, 0], sizes = [1, 128], strides = [1, 1]} : vector<9x128xf32> to vector<1x128xf32>
    %9 = vector.extract_strided_slice %0 {offsets = [8, 0], sizes = [1, 32], strides = [1, 1]} : vector<9x128xf32> to vector<1x32xf32>
    %c0_1 = arith.constant 0 : index
    %c0_2 = arith.constant 0 : index
    %10 = vector.load %arg0[%c0_1, %c0_2] : memref<64x96xf32, #tpu.memory_space<vmem>>, vector<64x96xf32>
    %c0_3 = arith.constant 0 : index
    %c0_4 = arith.constant 0 : index
    %11 = vector.load %arg1[%c0_3, %c0_4] : memref<96x32xf32, #tpu.memory_space<vmem>>, vector<96x32xf32>
    %cst = arith.constant dense<0.000000e+00> : vector<64x32xf32>
    %12 = tpu.matmul %10, %11, %cst {dimension_numbers = #tpu.dot_dimension_numbers<[1], [0], [0], [1], [0, 0, 1, 1], [], []>} : vector<64x96xf32>, vector<96x32xf32>, vector<64x32xf32> -> vector<64x32xf32>
    %13 = vector.broadcast %1 : vector<1x32xf32> to vector<64x32xf32>
    %14 = arith.addf %12, %13 : vector<64x32xf32>
    %cst_5 = arith.constant dense<0.000000e+00> : vector<64xf32>
    %15 = vector.multi_reduction <add>, %14, %cst_5 [1] : vector<64x32xf32> to vector<64xf32>
    %16 = vector.shape_cast %15 : vector<64xf32> to vector<64x1xf32>
    %17 = arith.mulf %14, %14 : vector<64x32xf32>
    %cst_6 = arith.constant dense<0.000000e+00> : vector<64xf32>
    %18 = vector.multi_reduction <add>, %17, %cst_6 [1] : vector<64x32xf32> to vector<64xf32>
    %19 = vector.shape_cast %18 : vector<64xf32> to vector<64x1xf32>
    %cst_7 = arith.constant 3.125000e-02 : f32
    %20 = vector.broadcast %cst_7 : f32 to vector<64x1xf32>
    %21 = arith.mulf %16, %20 : vector<64x1xf32>
    %cst_8 = arith.constant 3.125000e-02 : f32
    %22 = vector.broadcast %cst_8 : f32 to vector<64x1xf32>
    %23 = arith.mulf %19, %22 : vector<64x1xf32>
    %24 = arith.mulf %21, %21 : vector<64x1xf32>
    %25 = arith.subf %23, %24 : vector<64x1xf32>
    %26 = vector.broadcast %21 : vector<64x1xf32> to vector<64x32xf32>
    %27 = arith.subf %14, %26 : vector<64x32xf32>
    %cst_9 = arith.constant 9.99999974E-6 : f32
    %28 = vector.broadcast %cst_9 : f32 to vector<64x1xf32>
    %29 = arith.addf %25, %28 : vector<64x1xf32>
    %30 = math.rsqrt %29 : vector<64x1xf32>
    %31 = vector.broadcast %30 : vector<64x1xf32> to vector<64x32xf32>
    %32 = arith.mulf %27, %31 : vector<64x32xf32>
    %33 = vector.broadcast %2 : vector<1x32xf32> to vector<64x32xf32>
    %34 = arith.mulf %32, %33 : vector<64x32xf32>
    %35 = vector.broadcast %3 : vector<1x32xf32> to vector<64x32xf32>
    %36 = arith.addf %34, %35 : vector<64x32xf32>
    %c0_10 = arith.constant 0 : index
    %c0_11 = arith.constant 0 : index
    %37 = vector.load %arg2[%c0_10, %c0_11] : memref<32x96xf32, #tpu.memory_space<vmem>>, vector<32x96xf32>
    %cst_12 = arith.constant dense<0.000000e+00> : vector<64x96xf32>
    %38 = tpu.matmul %36, %37, %cst_12 {dimension_numbers = #tpu.dot_dimension_numbers<[1], [0], [0], [1], [0, 0, 1, 1], [], []>} : vector<64x32xf32>, vector<32x96xf32>, vector<64x96xf32> -> vector<64x96xf32>
    %39 = vector.broadcast %4 : vector<1x96xf32> to vector<64x96xf32>
    %40 = arith.addf %38, %39 : vector<64x96xf32>
    %41 = vector.extract_strided_slice %40 {offsets = [0, 0], sizes = [64, 8], strides = [1, 1]} : vector<64x96xf32> to vector<64x8xf32>
    %42 = vector.extract_strided_slice %40 {offsets = [0, 8], sizes = [64, 8], strides = [1, 1]} : vector<64x96xf32> to vector<64x8xf32>
    %43 = vector.extract_strided_slice %40 {offsets = [0, 16], sizes = [64, 8], strides = [1, 1]} : vector<64x96xf32> to vector<64x8xf32>
    %44 = vector.extract_strided_slice %40 {offsets = [0, 24], sizes = [64, 8], strides = [1, 1]} : vector<64x96xf32> to vector<64x8xf32>
    %45 = vector.shape_cast %41 : vector<64x8xf32> to vector<1x64x8xf32>
    %46 = vector.shape_cast %42 : vector<64x8xf32> to vector<1x64x8xf32>
    %47 = vector.shape_cast %43 : vector<64x8xf32> to vector<1x64x8xf32>
    %48 = vector.shape_cast %44 : vector<64x8xf32> to vector<1x64x8xf32>
    %49 = tpu.concatenate %45, %46, %47, %48 in 0 : vector<1x64x8xf32>, vector<1x64x8xf32>, vector<1x64x8xf32>, vector<1x64x8xf32> -> vector<4x64x8xf32>
    %50 = vector.shape_cast %49 : vector<4x64x8xf32> to vector<4x2x32x8xf32>
    %51 = tpu.transpose %50, [1, 0, 2, 3] : vector<4x2x32x8xf32> -> vector<2x4x32x8xf32>
    %52 = vector.shape_cast %51 : vector<2x4x32x8xf32> to vector<8x32x8xf32>
    %53 = vector.extract_strided_slice %40 {offsets = [0, 32], sizes = [64, 8], strides = [1, 1]} : vector<64x96xf32> to vector<64x8xf32>
    %54 = vector.extract_strided_slice %40 {offsets = [0, 40], sizes = [64, 8], strides = [1, 1]} : vector<64x96xf32> to vector<64x8xf32>
    %55 = vector.extract_strided_slice %40 {offsets = [0, 48], sizes = [64, 8], strides = [1, 1]} : vector<64x96xf32> to vector<64x8xf32>
    %56 = vector.extract_strided_slice %40 {offsets = [0, 56], sizes = [64, 8], strides = [1, 1]} : vector<64x96xf32> to vector<64x8xf32>
    %57 = vector.shape_cast %53 : vector<64x8xf32> to vector<1x64x8xf32>
    %58 = vector.shape_cast %54 : vector<64x8xf32> to vector<1x64x8xf32>
    %59 = vector.shape_cast %55 : vector<64x8xf32> to vector<1x64x8xf32>
    %60 = vector.shape_cast %56 : vector<64x8xf32> to vector<1x64x8xf32>
    %61 = tpu.concatenate %57, %58, %59, %60 in 0 : vector<1x64x8xf32>, vector<1x64x8xf32>, vector<1x64x8xf32>, vector<1x64x8xf32> -> vector<4x64x8xf32>
    %62 = vector.shape_cast %61 : vector<4x64x8xf32> to vector<4x2x32x8xf32>
    %63 = tpu.transpose %62, [1, 0, 2, 3] : vector<4x2x32x8xf32> -> vector<2x4x32x8xf32>
    %64 = vector.shape_cast %63 : vector<2x4x32x8xf32> to vector<8x32x8xf32>
    %65 = vector.extract_strided_slice %40 {offsets = [0, 64], sizes = [64, 8], strides = [1, 1]} : vector<64x96xf32> to vector<64x8xf32>
    %66 = vector.extract_strided_slice %40 {offsets = [0, 72], sizes = [64, 8], strides = [1, 1]} : vector<64x96xf32> to vector<64x8xf32>
    %67 = vector.extract_strided_slice %40 {offsets = [0, 80], sizes = [64, 8], strides = [1, 1]} : vector<64x96xf32> to vector<64x8xf32>
    %68 = vector.extract_strided_slice %40 {offsets = [0, 88], sizes = [64, 8], strides = [1, 1]} : vector<64x96xf32> to vector<64x8xf32>
    %69 = vector.shape_cast %65 : vector<64x8xf32> to vector<1x64x8xf32>
    %70 = vector.shape_cast %66 : vector<64x8xf32> to vector<1x64x8xf32>
    %71 = vector.shape_cast %67 : vector<64x8xf32> to vector<1x64x8xf32>
    %72 = vector.shape_cast %68 : vector<64x8xf32> to vector<1x64x8xf32>
    %73 = tpu.concatenate %69, %70, %71, %72 in 0 : vector<1x64x8xf32>, vector<1x64x8xf32>, vector<1x64x8xf32>, vector<1x64x8xf32> -> vector<4x64x8xf32>
    %74 = vector.shape_cast %73 : vector<4x64x8xf32> to vector<4x2x32x8xf32>
    %75 = tpu.transpose %74, [1, 0, 2, 3] : vector<4x2x32x8xf32> -> vector<2x4x32x8xf32>
    %76 = vector.shape_cast %75 : vector<2x4x32x8xf32> to vector<8x32x8xf32>
    "tpu.trace_start"() <{level = 10 : i32, message = "gqd,gkd->gqk"}> : () -> ()
    %cst_13 = arith.constant dense<0.000000e+00> : vector<8x32x32xf32>
    %77 = tpu.matmul %52, %64, %cst_13 {dimension_numbers = #tpu.dot_dimension_numbers<[2], [2], [1], [1], [0, 0, 0, 1, 1, 1], [0], [0]>} : vector<8x32x8xf32>, vector<8x32x8xf32>, vector<8x32x32xf32> -> vector<8x32x32xf32>
    "tpu.trace_stop"() : () -> ()
    %78 = vector.shape_cast %77 : vector<8x32x32xf32> to vector<2x4x32x32xf32>
    %c0_14 = arith.constant 0 : index
    %c0_15 = arith.constant 0 : index
    %c0_16 = arith.constant 0 : index
    %79 = vector.load %arg4[%c0_14, %c0_15, %c0_16] : memref<4x32x32xf32, #tpu.memory_space<vmem>>, vector<4x32x32xf32>
    %80 = vector.shape_cast %79 : vector<4x32x32xf32> to vector<1x4x32x32xf32>
    %81 = vector.broadcast %80 : vector<1x4x32x32xf32> to vector<2x4x32x32xf32>
    %82 = arith.addf %78, %81 : vector<2x4x32x32xf32>
    %83 = vector.shape_cast %82 : vector<2x4x32x32xf32> to vector<8x32x32xf32>
    %cst_17 = arith.constant dense<0xFF800000> : vector<8x32xf32>
    %84 = vector.multi_reduction <maximumf>, %83, %cst_17 [2] : vector<8x32x32xf32> to vector<8x32xf32>
    %85 = vector.shape_cast %84 : vector<8x32xf32> to vector<8x32x1xf32>
    %86 = vector.broadcast %85 : vector<8x32x1xf32> to vector<8x32x32xf32>
    %87 = arith.subf %83, %86 : vector<8x32x32xf32>
    %88 = math.exp %87 : vector<8x32x32xf32>
    %cst_18 = arith.constant dense<0.000000e+00> : vector<8x32xf32>
    %89 = vector.multi_reduction <add>, %88, %cst_18 [2] : vector<8x32x32xf32> to vector<8x32xf32>
    %90 = vector.shape_cast %89 : vector<8x32xf32> to vector<8x32x1xf32>
    %91 = tpu.reciprocal %90 {approx = true} : vector<8x32x1xf32> -> vector<8x32x1xf32>
    %92 = vector.broadcast %91 : vector<8x32x1xf32> to vector<8x32x32xf32>
    %93 = arith.mulf %88, %92 : vector<8x32x32xf32>
    "tpu.trace_start"() <{level = 10 : i32, message = "gqk,gkd->gqd"}> : () -> ()
    %cst_19 = arith.constant dense<0.000000e+00> : vector<8x32x8xf32>
    %94 = tpu.matmul %93, %76, %cst_19 {dimension_numbers = #tpu.dot_dimension_numbers<[2], [1], [1], [2], [0, 0, 0, 1, 1, 2], [0], [0]>} : vector<8x32x32xf32>, vector<8x32x8xf32>, vector<8x32x8xf32> -> vector<8x32x8xf32>
    "tpu.trace_stop"() : () -> ()
    %95 = vector.shape_cast %94 : vector<8x32x8xf32> to vector<2x4x32x8xf32>
    %96 = vector.extract_strided_slice %95 {offsets = [0, 0, 0, 0], sizes = [2, 1, 32, 8], strides = [1, 1, 1, 1]} : vector<2x4x32x8xf32> to vector<2x1x32x8xf32>
    %97 = vector.shape_cast %96 : vector<2x1x32x8xf32> to vector<2x32x8xf32>
    %98 = vector.extract_strided_slice %95 {offsets = [0, 1, 0, 0], sizes = [2, 1, 32, 8], strides = [1, 1, 1, 1]} : vector<2x4x32x8xf32> to vector<2x1x32x8xf32>
    %99 = vector.shape_cast %98 : vector<2x1x32x8xf32> to vector<2x32x8xf32>
    %100 = vector.extract_strided_slice %95 {offsets = [0, 2, 0, 0], sizes = [2, 1, 32, 8], strides = [1, 1, 1, 1]} : vector<2x4x32x8xf32> to vector<2x1x32x8xf32>
    %101 = vector.shape_cast %100 : vector<2x1x32x8xf32> to vector<2x32x8xf32>
    %102 = vector.extract_strided_slice %95 {offsets = [0, 3, 0, 0], sizes = [2, 1, 32, 8], strides = [1, 1, 1, 1]} : vector<2x4x32x8xf32> to vector<2x1x32x8xf32>
    %103 = vector.shape_cast %102 : vector<2x1x32x8xf32> to vector<2x32x8xf32>
    %104 = tpu.concatenate %97, %99, %101, %103 in 2 : vector<2x32x8xf32>, vector<2x32x8xf32>, vector<2x32x8xf32>, vector<2x32x8xf32> -> vector<2x32x32xf32>
    %105 = vector.shape_cast %104 : vector<2x32x32xf32> to vector<64x32xf32>
    %c0_20 = arith.constant 0 : index
    %c0_21 = arith.constant 0 : index
    %106 = vector.load %arg3[%c0_20, %c0_21] : memref<32x32xf32, #tpu.memory_space<vmem>>, vector<32x32xf32>
    %cst_22 = arith.constant dense<0.000000e+00> : vector<64x32xf32>
    %107 = tpu.matmul %105, %106, %cst_22 {dimension_numbers = #tpu.dot_dimension_numbers<[1], [0], [0], [1], [0, 0, 1, 1], [], []>} : vector<64x32xf32>, vector<32x32xf32>, vector<64x32xf32> -> vector<64x32xf32>
    %108 = vector.broadcast %5 : vector<1x32xf32> to vector<64x32xf32>
    %109 = arith.addf %107, %108 : vector<64x32xf32>
    %110 = arith.addf %14, %109 : vector<64x32xf32>
    %cst_23 = arith.constant dense<0.000000e+00> : vector<64xf32>
    %111 = vector.multi_reduction <add>, %110, %cst_23 [1] : vector<64x32xf32> to vector<64xf32>
    %112 = vector.shape_cast %111 : vector<64xf32> to vector<64x1xf32>
    %113 = arith.mulf %110, %110 : vector<64x32xf32>
    %cst_24 = arith.constant dense<0.000000e+00> : vector<64xf32>
    %114 = vector.multi_reduction <add>, %113, %cst_24 [1] : vector<64x32xf32> to vector<64xf32>
    %115 = vector.shape_cast %114 : vector<64xf32> to vector<64x1xf32>
    %cst_25 = arith.constant 3.125000e-02 : f32
    %116 = vector.broadcast %cst_25 : f32 to vector<64x1xf32>
    %117 = arith.mulf %112, %116 : vector<64x1xf32>
    %cst_26 = arith.constant 3.125000e-02 : f32
    %118 = vector.broadcast %cst_26 : f32 to vector<64x1xf32>
    %119 = arith.mulf %115, %118 : vector<64x1xf32>
    %120 = arith.mulf %117, %117 : vector<64x1xf32>
    %121 = arith.subf %119, %120 : vector<64x1xf32>
    %122 = vector.broadcast %117 : vector<64x1xf32> to vector<64x32xf32>
    %123 = arith.subf %110, %122 : vector<64x32xf32>
    %cst_27 = arith.constant 9.99999974E-6 : f32
    %124 = vector.broadcast %cst_27 : f32 to vector<64x1xf32>
    %125 = arith.addf %121, %124 : vector<64x1xf32>
    %126 = math.rsqrt %125 : vector<64x1xf32>
    %127 = vector.broadcast %126 : vector<64x1xf32> to vector<64x32xf32>
    %128 = arith.mulf %123, %127 : vector<64x32xf32>
    %129 = vector.broadcast %6 : vector<1x32xf32> to vector<64x32xf32>
    %130 = arith.mulf %128, %129 : vector<64x32xf32>
    %131 = vector.broadcast %7 : vector<1x32xf32> to vector<64x32xf32>
    %132 = arith.addf %130, %131 : vector<64x32xf32>
    %c0_28 = arith.constant 0 : index
    %c0_29 = arith.constant 0 : index
    %133 = vector.load %arg5[%c0_28, %c0_29] : memref<32x128xf32, #tpu.memory_space<vmem>>, vector<32x128xf32>
    %cst_30 = arith.constant dense<0.000000e+00> : vector<64x128xf32>
    %134 = tpu.matmul %132, %133, %cst_30 {dimension_numbers = #tpu.dot_dimension_numbers<[1], [0], [0], [1], [0, 0, 1, 1], [], []>} : vector<64x32xf32>, vector<32x128xf32>, vector<64x128xf32> -> vector<64x128xf32>
    %135 = vector.broadcast %8 : vector<1x128xf32> to vector<64x128xf32>
    %136 = arith.addf %134, %135 : vector<64x128xf32>
    %137 = arith.mulf %136, %136 : vector<64x128xf32>
    %138 = arith.mulf %136, %137 : vector<64x128xf32>
    %cst_31 = arith.constant 4.471500e-02 : f32
    %139 = vector.broadcast %cst_31 : f32 to vector<64x128xf32>
    %140 = arith.mulf %139, %138 : vector<64x128xf32>
    %141 = arith.addf %136, %140 : vector<64x128xf32>
    %cst_32 = arith.constant 0.797884583 : f32
    %142 = vector.broadcast %cst_32 : f32 to vector<64x128xf32>
    %143 = arith.mulf %142, %141 : vector<64x128xf32>
    %144 = math.tanh %143 : vector<64x128xf32>
    %cst_33 = arith.constant 1.000000e+00 : f32
    %145 = vector.broadcast %cst_33 : f32 to vector<64x128xf32>
    %146 = arith.addf %145, %144 : vector<64x128xf32>
    %cst_34 = arith.constant 5.000000e-01 : f32
    %147 = vector.broadcast %cst_34 : f32 to vector<64x128xf32>
    %148 = arith.mulf %147, %146 : vector<64x128xf32>
    %149 = arith.mulf %136, %148 : vector<64x128xf32>
    %c0_35 = arith.constant 0 : index
    %c0_36 = arith.constant 0 : index
    %150 = vector.load %arg6[%c0_35, %c0_36] : memref<128x32xf32, #tpu.memory_space<vmem>>, vector<128x32xf32>
    %cst_37 = arith.constant dense<0.000000e+00> : vector<64x32xf32>
    %151 = tpu.matmul %149, %150, %cst_37 {dimension_numbers = #tpu.dot_dimension_numbers<[1], [0], [0], [1], [0, 0, 1, 1], [], []>} : vector<64x128xf32>, vector<128x32xf32>, vector<64x32xf32> -> vector<64x32xf32>
    %152 = vector.broadcast %9 : vector<1x32xf32> to vector<64x32xf32>
    %153 = arith.addf %151, %152 : vector<64x32xf32>
    %154 = arith.addf %110, %153 : vector<64x32xf32>
    %c0_38 = arith.constant 0 : index
    %c0_39 = arith.constant 0 : index
    %155 = vector.load %arg8[%c0_38, %c0_39] : memref<64x32xf32, #tpu.memory_space<vmem>>, vector<64x32xf32>
    tpu.vector_store %arg8[%c0_38, %c0_39], %154 {strides = array<i32>} : memref<64x32xf32, #tpu.memory_space<vmem>>, vector<64x32xf32>,
    return
  }
}

</mosaic_0001>

<bundles_post_ra>
// kernel: tpu_custom_call.1
= control target key start
LH: loop header
LB: loop body
LE: loop exit
PB: predicated region body
PF: predicated region fallthrough
CT: control target
= control target key end

     0   :  { %13 = vsyncpa [#allocation3], 0  ;;  %s4760_s27 = smov [#allocation2]   ;;  %s6141_s0 = inlined_call_operand.vmem [shape: f32[64,96], index: 0, kind: input, shape index: {}]   ;;  %s6142_s1 = inlined_call_operand.vmem [shape: f32[96,32], index: 1, kind: input, shape index: {}]   ;;  %s6143_s2 = inlined_call_operand.vmem [shape: f32[32,96], index: 2, kind: input, shape index: {}]   ;;  %s6144_s3 = inlined_call_operand.vmem [shape: f32[32,32], index: 3, kind: input, shape index: {}]   ;;  %s6145_s4 = inlined_call_operand.vmem [shape: f32[4,32,32], index: 4, kind: input, shape index: {}]   ;;  %s6146_s5 = inlined_call_operand.hbm [shape: f32[32,128], index: 5, kind: input, shape index: {}]   ;;  %s6147_s6 = inlined_call_operand.vmem [shape: f32[128,32], index: 6, kind: input, shape index: {}]   ;;  %s6148_s7 = inlined_call_operand.vmem [shape: f32[9,128], index: 7, kind: input, shape index: {}]   ;;  %s6149_s8 = inlined_call_operand.vmem [shape: f32[64,32], index: 8, kind: output, shape index: {}]  }
   0x1   :  { %s29_s28 = sshll.u32 %s4760_s27, 4  ;;  %s4736_s9 = scalar_lea.hbm %s6146_s5, 512  ;;  %s30_s28 = int_to_ptr.vmem [resolvable:$true] %s29_s28 }
   0x2   :  { %p4737_p0 = scmp.ne.s32.totalorder %s6146_s5, %s4736_s9  ;;  %p4740_p1 = scmp.lt.u32.totalorder %s4736_s9, %s6146_s5 }
   0x4   :  { %p4742_p2 = pnand %p4740_p1, %p4737_p0 }
   0x6   :  { %4745 = shalt.err (!%p4742_p2)
}
   0x7   :  { %s4746_s14 = scalar_lea.vmem %s30_s28, 512  ;;  %p4751_p4 = scmp.lt.s32.totalorder %s30_s28, %s30_s28 }
   0x8   :  { %p4747_p3 = scmp.ne.s32.totalorder %s30_s28, %s4746_s14  ;;  %p4752_p5 = scmp.lt.s32.totalorder %s4746_s14, %s4746_s14 }
   0xa   :  { %p4753_p6 = por %p4752_p5, %p4751_p4 }
   0xc   :  { %p4754_p7 = pnand %p4753_p6, %p4747_p3 }
   0xe   :  { %4757 = shalt.err (!%p4754_p7)
}
   0xf   :  { %s4761_s15 = smov 128   ;;  %s4762_s16 = smov 8  }
  0x10   :  { %35 = dma.hbm_to_vmem [thread:$0]  %s6146_s5, 512, %s30_s28, [#allocation3], %s4761_s15, %s4761_s15, %s4762_s16  }
  0x11   :  { %4758 = dma.done.wait [#allocation3], 512  }
  0x12   :  { %4759 = vsyncadd [#allocation3], 4294966784  ;;  %v53_v0 = vld [vmem:[%s6142_s1] sm:$0xff]  ;;  %v54_v1 = vld [vmem:[%s6142_s1 + $0x8] sm:$0xff]  ;;  %vm69_vm0 = vcmask 785408   ;;  %v65_v26 = vlaneseq  ;;  %vm199_vm1 = vcmask 261120  }
  0x13   :  { %v55_v2 = vld [vmem:[%s6142_s1 + $0x10] sm:$0xff]  ;;  %v4149_v3 = vpack.c.bf16 %v54_v1, %v53_v0  ;;  %v56_v4 = vld [vmem:[%s6142_s1 + $0x18] sm:$0xff]  ;;  %v57_v6 = vld [vmem:[%s6142_s1 + $0x20] sm:$0xff]  ;;  %vm545_vm2 = vcmask 64512   ;;  %s4764_s23 = smov 112   ;;  %s4765_s24 = smov 104  }
  0x14   :  { %v4153_v5 = vpack.c.bf16 %v56_v4, %v55_v2  ;;  %v58_v7 = vld [vmem:[%s6142_s1 + $0x28] sm:$0xff]  ;;  %v45_v8 = vld [vmem:[%s6141_s0] sm:$0xff]  ;;  %v59_v10 = vld [vmem:[%s6142_s1 + $0x30] sm:$0xff]  ;;  %v4896_v27 = vshrl.u32 %v65_v26, 7  ;;  %s4766_s25 = smov 96   ;;  %s4767_s26 = smov 64  }
  0x15   :  { %4150 = vmatprep.subr.bf16.mxu0 %v4149_v3  ;;  %v4157_v9 = vpack.c.bf16 %v58_v7, %v57_v6  ;;  %3809 = vmatprep.mubr.msk.f32.mxu0 %vm69_vm0, %v45_v8  ;;  %v60_v11 = vld [vmem:[%s6142_s1 + $0x38] sm:$0xff]  ;;  %v61_v13 = vld [vmem:[%s6142_s1 + $0x40] sm:$0xff]  ;;  %v62_v14 = vld [vmem:[%s6142_s1 + $0x48] sm:$0xff]  ;;  %s4768_s17 = smov 24   ;;  %s4769_s18 = smov 16   ;;  %vm2786_vm4 = vcmask 130048  }
  0x16   :  { %4152 = vmatpush3.bf16.msra.mxu0 %v4149_v3  ;;  %v4161_v12 = vpack.c.bf16 %v60_v11, %v59_v10  ;;  %v4165_v15 = vpack.c.bf16 %v62_v14, %v61_v13  ;;  %v63_v16 = vld [vmem:[%s6142_s1 + $0x50] sm:$0xff]  ;;  %v64_v17 = vld [vmem:[%s6142_s1 + $0x58] sm:$0xff]  ;;  %v46_v19 = vld [vmem:[%s6141_s0 + $0x8] sm:$0xff]  ;;  %v67_v28 = vsub.s32 0, %v4896_v27  ;;  %vm2795_vm5 = vcmask 195584  }
  0x17   :  { %4154 = vmatprep.subr.bf16.mxu0 %v4153_v5  ;;  %v4169_v18 = vpack.c.bf16 %v64_v17, %v63_v16  ;;  %v47_v20 = vld [vmem:[%s6141_s0 + $0x10] sm:$0xff]  ;;  %v48_v21 = vld [vmem:[%s6141_s0 + $0x18] sm:$0xff]  ;;  %v49_v22 = vld [vmem:[%s6141_s0 + $0x20] sm:$0xff] }
  0x18   :  { %v50_v23 = vld [vmem:[%s6141_s0 + $0x28] sm:$0xff]  ;;  %v51_v24 = vld [vmem:[%s6141_s0 + $0x30] sm:$0xff]  ;;  %v52_v25 = vld [vmem:[%s6141_s0 + $0x38] sm:$0xff] }
  0x19   :  { %v4902_v29 = vld [vmem:[%s6148_s7] sm:$0xff]  ;;  %v345_v8 = vld [vmem:[%s6143_s2 + $0x8] sm:$0xff]  ;;  %v346_v10 = vld [vmem:[%s6143_s2 + $0x10] sm:$0xff] }
  0x1a   :  { %4156 = vmatpush3.bf16.msra.mxu0 %v4153_v5  ;;  %v68_v30 = vrot.slane %v4902_v29, %v67_v28  ;;  %v344_v7 = vld [vmem:[%s6143_s2] sm:$0xff]  ;;  %v347_v11 = vld [vmem:[%s6143_s2 + $0x18] sm:$0xff]  ;;  %s4763_s2 = smov 120   ;;  %vm5140_vm3 = vmpackc.low %vm545_vm2, %vm545_vm2 }
  0x1b   :  { %4158 = vmatprep.subr.bf16.mxu0 %v4157_v9 }
  0x1e   :  { %4160 = vmatpush3.bf16.msra.mxu0 %v4157_v9  ;;  %v4173_v9 = vpack.c.bf16 %v345_v8, %v344_v7 }
  0x1f   :  { %4162 = vmatprep.subr.bf16.mxu0 %v4161_v12 }
  0x20   :  { %4174 = vmatprep.subr.bf16.mxu1 %v4173_v9 }
  0x21   :  { %4176 = vmatpush3.bf16.msra.mxu1 %v4173_v9 }
  0x22   :  { %4164 = vmatpush3.bf16.msra.mxu0 %v4161_v12  ;;  %v4177_v12 = vpack.c.bf16 %v347_v11, %v346_v10 }
  0x23   :  { %4166 = vmatprep.subr.bf16.mxu0 %v4165_v15 }
  0x24   :  { %4178 = vmatprep.subr.bf16.mxu1 %v4177_v12 }
  0x25   :  { %4180 = vmatpush3.bf16.msra.mxu1 %v4177_v12 }
  0x26   :  { %4168 = vmatpush3.bf16.msra.mxu0 %v4165_v15 }
  0x27   :  { %4170 = vmatprep.subr.bf16.mxu0 %v4169_v18 }
  0x2a   :  { %4172 = vmatpush3.bf16.msra.mxu0 %v4169_v18 }
  0x2d   :  { %3810 = vmatmul.mubr.msk.f32.vlgmr.msra.gmra.mrb[0].mxu0 %vm69_vm0, %v46_v19 }
  0x2e   :  { %3812 = vmatprep.mubr.msk.f32.mxu0 %vm69_vm0, %v47_v20 }
  0x31   :  { %3813 = vmatmul.mubr.msk.f32.gmra.mrb[2].mxu0 %vm69_vm0, %v48_v21 }
  0x32   :  { %3815 = vmatprep.mubr.msk.f32.mxu0 %vm69_vm0, %v49_v22 }
  0x35   :  { %3816 = vmatmul.mubr.msk.f32.gmra.mrb[4].mxu0 %vm69_vm0, %v50_v23 }
  0x36   :  { %3818 = vmatprep.mubr.msk.f32.mxu0 %vm69_vm0, %v51_v24 }
  0x39   :  { %3819 = vmatmul.mubr.msk.f32.gmra.mrb[6].mxu0 %vm69_vm0, %v52_v25 }
 0x100   :  { %v3811_v31 = vpop.f32.mrb[0].mxu0 }
 0x101   :  { %v160_v32 = vpop.f32.mrb[1].mxu0  ;;  %v4905_v33 = vadd.f32 %v3811_v31, %v68_v30 }
 0x102   :  { %v4907_v34 = vadd.f32 %v160_v32, %v68_v30 }
 0x103   :  { %v225_v41 = vmul.f32 %v4905_v33, %v4905_v33  ;;  %v203_v42 = vsel %vm199_vm1, %v4905_v33, 0.0 }
 0x104   :  { %v200_v35 = vsel %vm199_vm1, %v4907_v34, 0.0  ;;  %v224_v36 = vmul.f32 %v4907_v34, %v4907_v34  ;;  %v3814_v37 = vpop.f32.mrb[2].mxu0 }
 0x105   :  { %201 = vadd.xlane.f32.xlu0 %v200_v35  ;;  %v170_v38 = vpop.f32.mrb[3].mxu0  ;;  %v4920_v45 = vadd.f32 %v3814_v37, %v68_v30  ;;  %v235_v46 = vsel %vm199_vm1, %v225_v41, 0.0 }
 0x106   :  { %v232_v39 = vsel %vm199_vm1, %v224_v36, 0.0  ;;  %v4914_v40 = vadd.f32 %v170_v38, %v68_v30 }
 0x107   :  { %233 = vadd.xlane.f32.xlu1 %v232_v39  ;;  %6157 = vst [vmem:[#allocation6_spill] sm:$0xff] %v4920_v45  ;;  %v209_v51 = vsel %vm199_vm1, %v4920_v45, 0.0  ;;  %v227_v53 = vmul.f32 %v4920_v45, %v4920_v45  ;;  %v322_v39 = vsub.s32 1, %v4896_v27 }
 0x108   :  { %6156 = vst [vmem:[#allocation5_spill] sm:$0xff] %v4914_v40  ;;  %v3817_v43 = vpop.f32.mrb[4].mxu0  ;;  %v206_v47 = vsel %vm199_vm1, %v4914_v40, 0.0  ;;  %v226_v48 = vmul.f32 %v4914_v40, %v4914_v40 }
 0x109   :  { %204 = vadd.xlane.f32.xlu0 %v203_v42  ;;  %v180_v44 = vpop.f32.mrb[5].mxu0  ;;  %v4933_v54 = vadd.f32 %v3817_v43, %v68_v30  ;;  %v241_v56 = vsel %vm199_vm1, %v227_v53, 0.0  ;;  %v4983_v53 = vrot.slane %v4902_v29, %v322_v39 }
 0x10a   :  { %v4929_v52 = vadd.f32 %v180_v44, %v68_v30  ;;  %v238_v55 = vsel %vm199_vm1, %v226_v48, 0.0 }
 0x10b   :  { %236 = vadd.xlane.f32.xlu1 %v235_v46  ;;  %6159 = vst [vmem:[#allocation8_spill] sm:$0xff] %v4933_v54  ;;  %v215_v59 = vsel %vm199_vm1, %v4933_v54, 0.0  ;;  %v229_v60 = vmul.f32 %v4933_v54, %v4933_v54  ;;  %v334_v46 = vsub.s32 2, %v4896_v27 }
 0x10c   :  { %v3820_v49 = vpop.f32.mrb[6].mxu0  ;;  %6158 = vst [vmem:[#allocation7_spill] sm:$0xff] %v4929_v52  ;;  %v212_v57 = vsel %vm199_vm1, %v4929_v52, 0.0  ;;  %v228_v58 = vmul.f32 %v4929_v52, %v4929_v52 }
 0x10d   :  { %207 = vadd.xlane.f32.xlu0 %v206_v47  ;;  %v190_v50 = vpop.f32.mrb[7].mxu0  ;;  %v4948_v63 = vadd.f32 %v3820_v49, %v68_v30  ;;  %v247_v0 = vsel %vm199_vm1, %v229_v60, 0.0 }
 0x10e   :  { %v4945_v61 = vadd.f32 %v190_v50, %v68_v30  ;;  %v244_v62 = vsel %vm199_vm1, %v228_v58, 0.0 }
 0x10f   :  { %210 = vadd.xlane.f32.xlu1 %v209_v51  ;;  %6161 = vst [vmem:[#allocation10_spill] sm:$0xff] %v4948_v63  ;;  %v221_v3 = vsel %vm199_vm1, %v4948_v63, 0.0  ;;  %v231_v4 = vmul.f32 %v4948_v63, %v4948_v63 }
 0x110   :  { %6160 = vst [vmem:[#allocation9_spill] sm:$0xff] %v4945_v61  ;;  %v218_v1 = vsel %vm199_vm1, %v4945_v61, 0.0  ;;  %v230_v2 = vmul.f32 %v4945_v61, %v4945_v61 }
 0x111   :  { %239 = vadd.xlane.f32.xlu0 %v238_v55  ;;  %v253_v6 = vsel %vm199_vm1, %v231_v4, 0.0 }
 0x112   :  { %v250_v5 = vsel %vm199_vm1, %v230_v2, 0.0 }
 0x113   :  { %242 = vadd.xlane.f32.xlu1 %v241_v56 }
 0x115   :  { %213 = vadd.xlane.f32.xlu0 %v212_v57 }
 0x117   :  { %216 = vadd.xlane.f32.xlu1 %v215_v59 }
 0x119   :  { %245 = vadd.xlane.f32.xlu0 %v244_v62  ;;  %v4988_v62 = vrot.slane %v4902_v29, %v334_v46 }
 0x11b   :  { %248 = vadd.xlane.f32.xlu1 %v247_v0 }
 0x11d   :  { %219 = vadd.xlane.f32.xlu0 %v218_v1 }
 0x11f   :  { %222 = vadd.xlane.f32.xlu1 %v221_v3 }
 0x121   :  { %251 = vadd.xlane.f32.xlu0 %v250_v5 }
 0x123   :  { %254 = vadd.xlane.f32.xlu1 %v253_v6 }
 0x192   :  { %v202_v13 = vpop.xlane.xlu0 %201 }
 0x193   :  { %v256_v14 = vmul.f32 0.03125, %v202_v13 }
 0x194   :  { %v234_v15 = vpop.xlane.xlu1 %233 }
 0x195   :  { %v272_v16 = vmul.f32 %v256_v14, %v256_v14  ;;  %v264_v17 = vmul.f32 0.03125, %v234_v15  ;;  %v288_v50 = vsub.f32 %v4907_v34, %v256_v14 }
 0x196   :  { %v205_v18 = vpop.xlane.xlu0 %204 }
 0x197   :  { %v280_v19 = vsub.f32 %v264_v17, %v272_v16  ;;  %v257_v20 = vmul.f32 0.03125, %v205_v18 }
 0x198   :  { %v237_v21 = vpop.xlane.xlu1 %236 }
 0x199   :  { %v296_v22 = vadd.f32 1e-05, %v280_v19  ;;  %v273_v23 = vmul.f32 %v257_v20, %v257_v20  ;;  %v265_v24 = vmul.f32 0.03125, %v237_v21  ;;  %v289_v1 = vsub.f32 %v4905_v33, %v257_v20 }
 0x19a   :  { %v208_v25 = vpop.xlane.xlu0 %207 }
 0x19b   :  { %4559 = vrsqrt.f32 %v296_v22  ;;  %v281_v26 = vsub.f32 %v265_v24, %v273_v23  ;;  %v258_v28 = vmul.f32 0.03125, %v208_v25 }
 0x19c   :  { %v211_v30 = vpop.xlane.xlu1 %210 }
 0x19d   :  { %v297_v31 = vadd.f32 1e-05, %v281_v26  ;;  %v4973_v32 = vmul.f32 0.03125, %v211_v30  ;;  %v274_v36 = vmul.f32 %v258_v28, %v258_v28  ;;  %v290_v18 = vsub.f32 %v4914_v40, %v258_v28 }
 0x19e   :  { %v240_v35 = vpop.xlane.xlu0 %239 }
 0x19f   :  { %4561 = vrsqrt.f32 %v297_v31  ;;  %v266_v37 = vmul.f32 0.03125, %v240_v35  ;;  %v275_v41 = vmul.f32 %v4973_v32, %v4973_v32  ;;  %v291_v24 = vsub.f32 %v4920_v45, %v4973_v32 }
 0x1a0   :  { %v243_v38 = vpop.xlane.xlu1 %242 }
 0x1a1   :  { %v282_v42 = vsub.f32 %v266_v37, %v274_v36  ;;  %v267_v43 = vmul.f32 0.03125, %v243_v38 }
 0x1a2   :  { %v214_v44 = vpop.xlane.xlu0 %213 }
 0x1a3   :  { %v298_v47 = vadd.f32 1e-05, %v282_v42  ;;  %v283_v48 = vsub.f32 %v267_v43, %v275_v41  ;;  %v4979_v49 = vmul.f32 0.03125, %v214_v44 }
 0x1a4   :  { %v217_v51 = vpop.xlane.xlu1 %216 }
 0x1a5   :  { %v4560_v55 = vpop.eup %4559  ;;  %4563 = vrsqrt.f32 %v298_v47  ;;  %v299_v56 = vadd.f32 1e-05, %v283_v48  ;;  %v276_v57 = vmul.f32 %v4979_v49, %v4979_v49  ;;  %v261_v58 = vmul.f32 0.03125, %v217_v51 }
 0x1a6   :  { %v246_v59 = vpop.xlane.xlu0 %245  ;;  %v312_v60 = vmul.f32 %v4560_v55, %v288_v50  ;;  %v292_v32 = vsub.f32 %v4929_v52, %v4979_v49 }
 0x1a7   :  { %4565 = vrsqrt.f32 %v299_v56  ;;  %v268_v0 = vmul.f32 0.03125, %v246_v59  ;;  %v277_v2 = vmul.f32 %v261_v58, %v261_v58  ;;  %v293_v47 = vsub.f32 %v4933_v54, %v261_v58 }
 0x1a8   :  { %v249_v3 = vpop.xlane.xlu1 %248  ;;  %v324_v4 = vmul.f32 %v4983_v53, %v312_v60 }
 0x1a9   :  { %v4562_v5 = vpop.eup %4561  ;;  %v284_v6 = vsub.f32 %v268_v0, %v276_v57  ;;  %v269_v7 = vmul.f32 0.03125, %v249_v3 }
 0x1aa   :  { %v220_v8 = vpop.xlane.xlu0 %219  ;;  %v336_v9 = vadd.f32 %v4988_v62, %v324_v4  ;;  %v313_v10 = vmul.f32 %v4562_v5, %v289_v1 }
 0x1ab   :  { %v300_v11 = vadd.f32 1e-05, %v284_v6  ;;  %v285_v12 = vsub.f32 %v269_v7, %v277_v2  ;;  %v262_v13 = vmul.f32 0.03125, %v220_v8  ;;  %v350_v7 = vsub.s32 3, %v4896_v27 }
 0x1ac   :  { %v223_v14 = vpop.xlane.xlu1 %222  ;;  %3829 = vmatprep.mubr.msk.f32.mxu1 %vm199_vm1, %v336_v9  ;;  %v325_v15 = vmul.f32 %v4983_v53, %v313_v10 }
 0x1ad   :  { %4567 = vrsqrt.f32 %v300_v11  ;;  %v301_v16 = vadd.f32 1e-05, %v285_v12  ;;  %v278_v17 = vmul.f32 %v262_v13, %v262_v13  ;;  %v263_v19 = vmul.f32 0.03125, %v223_v14 }
 0x1ae   :  { %v252_v20 = vpop.xlane.xlu0 %251  ;;  %v337_v21 = vadd.f32 %v4988_v62, %v325_v15  ;;  %v294_v49 = vsub.f32 %v4945_v61, %v262_v13  ;;  %v351_v8 = vrot.slane %v4902_v29, %v350_v7 }
 0x1af   :  { %v4564_v22 = vpop.eup %4563  ;;  %4569 = vrsqrt.f32 %v301_v16  ;;  %v270_v23 = vmul.f32 0.03125, %v252_v20  ;;  %v279_v25 = vmul.f32 %v263_v19, %v263_v19  ;;  %v295_v58 = vsub.f32 %v4948_v63, %v263_v19 }
 0x1b0   :  { %v255_v26 = vpop.xlane.xlu1 %254  ;;  %3830 = vmatmul.mubr.msk.f32.vlgmr.msra.gmra.mrb[0].mxu1 %vm199_vm1, %v337_v21  ;;  %v314_v30 = vmul.f32 %v4564_v22, %v290_v18 }
 0x1b1   :  { %v4566_v31 = vpop.eup %4565  ;;  %v286_v35 = vsub.f32 %v270_v23, %v278_v17  ;;  %v271_v36 = vmul.f32 0.03125, %v255_v26 }
 0x1b2   :  { %v326_v28 = vmul.f32 %v4983_v53, %v314_v30  ;;  %v315_v37 = vmul.f32 %v4566_v31, %v291_v24 }
 0x1b3   :  { %v302_v38 = vadd.f32 1e-05, %v286_v35  ;;  %v287_v39 = vsub.f32 %v271_v36, %v279_v25 }
 0x1b4   :  { %v338_v41 = vadd.f32 %v4988_v62, %v326_v28  ;;  %v327_v42 = vmul.f32 %v4983_v53, %v315_v37 }
 0x1b5   :  { %4571 = vrsqrt.f32 %v302_v38  ;;  %v303_v43 = vadd.f32 1e-05, %v287_v39 }
 0x1b6   :  { %3832 = vmatprep.mubr.msk.f32.mxu1 %vm199_vm1, %v338_v41  ;;  %v339_v44 = vadd.f32 %v4988_v62, %v327_v42 }
 0x1b7   :  { %v4568_v46 = vpop.eup %4567  ;;  %4573 = vrsqrt.f32 %v303_v43 }
 0x1b8   :  { %3833 = vmatmul.mubr.msk.f32.gmra.mrb[2].mxu1 %vm199_vm1, %v339_v44  ;;  %v316_v48 = vmul.f32 %v4568_v46, %v292_v32 }
 0x1b9   :  { %v4570_v50 = vpop.eup %4569 }
 0x1ba   :  { %v328_v51 = vmul.f32 %v4983_v53, %v316_v48  ;;  %v317_v55 = vmul.f32 %v4570_v50, %v293_v47 }
 0x1bc   :  { %v340_v56 = vadd.f32 %v4988_v62, %v328_v51  ;;  %v329_v57 = vmul.f32 %v4983_v53, %v317_v55 }
 0x1be   :  { %3835 = vmatprep.mubr.msk.f32.mxu1 %vm199_vm1, %v340_v56  ;;  %v341_v59 = vadd.f32 %v4988_v62, %v329_v57 }
 0x1bf   :  { %v4572_v60 = vpop.eup %4571 }
 0x1c0   :  { %3836 = vmatmul.mubr.msk.f32.gmra.mrb[4].mxu1 %vm199_vm1, %v341_v59  ;;  %v318_v0 = vmul.f32 %v4572_v60, %v294_v49 }
 0x1c1   :  { %v4574_v1 = vpop.eup %4573 }
 0x1c2   :  { %v330_v2 = vmul.f32 %v4983_v53, %v318_v0  ;;  %v319_v3 = vmul.f32 %v4574_v1, %v295_v58 }
 0x1c4   :  { %v342_v4 = vadd.f32 %v4988_v62, %v330_v2  ;;  %v331_v5 = vmul.f32 %v4983_v53, %v319_v3 }
 0x1c6   :  { %3838 = vmatprep.mubr.msk.f32.mxu1 %vm199_vm1, %v342_v4  ;;  %v343_v6 = vadd.f32 %v4988_v62, %v331_v5 }
 0x1c8   :  { %3839 = vmatmul.mubr.msk.f32.gmra.mrb[6].mxu1 %vm199_vm1, %v343_v6 }
 0x283   :  { %v3831_v9 = vpop.f32.mrb[0].mxu1 }
 0x284   :  { %v5025_v10 = vadd.f32 %v3831_v9, %v351_v8  ;;  %v442_v11 = vpop.f32.mrb[1].mxu1 }
 0x285   :  { %v443_v12 = vadd.f32 %v442_v11, %v351_v8 }
 0x286   :  { %491 = vrot.lane.b32.xlu1 %v5025_v10, %s4763_s2 }
 0x287   :  { %489 = vrot.lane.b32.xlu0 %v443_v12, %s4763_s2  ;;  %3849 = vmatprep.mubr.msk.f32.mxu1 %vm545_vm2, %v443_v12  ;;  %v5054_v19 = vpack.i.bf16 %v5025_v10, %v443_v12 }
 0x28b   :  { %505 = vrot.lane.b32.xlu0 %v443_v12, %s4764_s23  ;;  %v3834_v53 = vpop.f32.mrb[2].mxu1 }
 0x28c   :  { %v452_v62 = vpop.f32.mrb[3].mxu1  ;;  %v5037_v13 = vadd.f32 %v3834_v53, %v351_v8 }
 0x28d   :  { %v5032_v29 = vadd.f32 %v452_v62, %v351_v8 }
 0x28f   :  { %521 = vrot.lane.b32.xlu0 %v443_v12, %s4765_s24  ;;  %493 = vrot.lane.b32.xlu1 %v5032_v29, %s4763_s2  ;;  %v5088_v23 = vpack.i.bf16 %v5037_v13, %v5032_v29 }
 0x293   :  { %509 = vrot.lane.b32.xlu0 %v5032_v29, %s4764_s23  ;;  %495 = vrot.lane.b32.xlu1 %v5037_v13, %s4763_s2  ;;  %v3837_v14 = vpop.f32.mrb[4].mxu1 }
 0x294   :  { %v462_v15 = vpop.f32.mrb[5].mxu1  ;;  %v5066_v21 = vadd.f32 %v3837_v14, %v351_v8 }
 0x295   :  { %v5047_v16 = vadd.f32 %v462_v15, %v351_v8 }
 0x297   :  { %525 = vrot.lane.b32.xlu0 %v5032_v29, %s4765_s24  ;;  %507 = vrot.lane.b32.xlu1 %v5025_v10, %s4764_s23  ;;  %v4439_v57 = vpack.i.bf16 %v5066_v21, %v5047_v16 }
 0x29b   :  { %523 = vrot.lane.b32.xlu1 %v5025_v10, %s4765_s24  ;;  %497 = vrot.lane.b32.xlu0 %v5047_v16, %s4763_s2  ;;  %v3840_v17 = vpop.f32.mrb[6].mxu1 }
 0x29c   :  { %v472_v18 = vpop.f32.mrb[7].mxu1  ;;  %v5076_v22 = vadd.f32 %v3840_v17, %v351_v8 }
 0x29d   :  { %v5060_v20 = vadd.f32 %v472_v18, %v351_v8 }
 0x29f   :  { %511 = vrot.lane.b32.xlu1 %v5037_v13, %s4764_s23  ;;  %4400 = vrot.lane.b32.xlu0 %v5054_v19, %s4766_s25  ;;  %v4449_v58 = vpack.i.bf16 %v5076_v22, %v5060_v20 }
 0x2a3   :  { %527 = vrot.lane.b32.xlu1 %v5037_v13, %s4765_s24  ;;  %501 = vrot.lane.b32.xlu0 %v5060_v20, %s4763_s2 }
 0x2a7   :  { %499 = vrot.lane.b32.xlu1 %v5066_v21, %s4763_s2  ;;  %515 = vrot.lane.b32.xlu0 %v5066_v21, %s4764_s23 }
 0x2ab   :  { %513 = vrot.lane.b32.xlu1 %v5047_v16, %s4764_s23  ;;  %531 = vrot.lane.b32.xlu0 %v5066_v21, %s4765_s24 }
 0x2af   :  { %503 = vrot.lane.b32.xlu1 %v5076_v22, %s4763_s2  ;;  %517 = vrot.lane.b32.xlu0 %v5060_v20, %s4764_s23 }
 0x2b3   :  { %529 = vrot.lane.b32.xlu1 %v5047_v16, %s4765_s24  ;;  %533 = vrot.lane.b32.xlu0 %v5060_v20, %s4765_s24 }
 0x2b7   :  { %4405 = vrot.lane.b32.xlu1 %v5088_v23, %s4766_s25 }
 0x2bb   :  { %519 = vrot.lane.b32.xlu1 %v5076_v22, %s4764_s23 }
 0x2bf   :  { %535 = vrot.lane.b32.xlu1 %v5076_v22, %s4765_s24 }
 0x2f8   :  { %v5096_v24 = vpop.permute.xlu1 %491 }
 0x2f9   :  { %v5098_v25 = vpop.permute.xlu0 %489 }
 0x2fa   :  { %v5102_v26 = vpack.i.bf16 %v5096_v24, %v5098_v25 }
 0x2fc   :  { %4410 = vrot.lane.b32.xlu0 %v5102_v26, %s4766_s25 }
 0x2fd   :  { %v5106_v30 = vpop.permute.xlu0 %505 }
 0x301   :  { %v5108_v31 = vpop.permute.xlu1 %493  ;;  %v522_v35 = vpop.permute.xlu0 %521 }
 0x302   :  { %3891 = vmatprep.mubr.msk.f32.mxu0 %vm545_vm2, %v522_v35 }
 0x305   :  { %v5111_v36 = vpop.permute.xlu1 %495  ;;  %v5113_v28 = vpop.permute.xlu0 %509 }
 0x306   :  { %v5117_v37 = vpack.i.bf16 %v5111_v36, %v5108_v31 }
 0x308   :  { %4415 = vrot.lane.b32.xlu1 %v5117_v37, %s4766_s25 }
 0x309   :  { %v5121_v38 = vpop.permute.xlu1 %507  ;;  %v5123_v39 = vpop.permute.xlu0 %525 }
 0x30a   :  { %v4419_v41 = vpack.i.bf16 %v5121_v38, %v5106_v30 }
 0x30c   :  { %4420 = vrot.lane.b32.xlu0 %v4419_v41, %s4766_s25 }
 0x30d   :  { %v5128_v42 = vpop.permute.xlu1 %523  ;;  %v5130_v43 = vpop.permute.xlu0 %497 }
 0x30e   :  { %v4424_v32 = vpack.i.bf16 %v5128_v42, %v522_v35 }
 0x310   :  { %4425 = vrot.lane.b32.xlu1 %v4424_v32, %s4766_s25 }
 0x311   :  { %v5134_v44 = vpop.permute.xlu1 %511  ;;  %v4401_v46 = vpop.permute.xlu0 %4400 }
 0x312   :  { %v4403_v47 = vunpack.i.h.bf16 %v4401_v46  ;;  %v4402_v48 = vunpack.i.l.bf16 %v4401_v46  ;;  %v4429_v50 = vpack.i.bf16 %v5134_v44, %v5113_v28 }
 0x314   :  { %v4181_v55 = vpack.c.bf16 %v4403_v47, %v4402_v48  ;;  %4430 = vrot.lane.b32.xlu0 %v4429_v50, %s4766_s25 }
 0x315   :  { %v5145_v56 = vpop.permute.xlu1 %527  ;;  %v5153_v59 = vpop.permute.xlu0 %501 }
 0x316   :  { %4183 = vmatprep.subr.msk.bf16.mxu1 %vm5140_vm3, %v4181_v55  ;;  %v4434_v49 = vpack.i.bf16 %v5145_v56, %v5123_v39 }
 0x317   :  { %4186 = vmatpush3.bf16.xpose.msk.msra.mxu1 %vm5140_vm3, %v4181_v55 }
 0x318   :  { %4440 = vrot.lane.b32.xlu0 %v4439_v57, %s4766_s25  ;;  %4435 = vrot.lane.b32.xlu1 %v4434_v49, %s4766_s25 }
 0x319   :  { %v5159_v60 = vpop.permute.xlu1 %499  ;;  %v5167_v1 = vpop.permute.xlu0 %515 }
 0x31a   :  { %v4444_v0 = vpack.i.bf16 %v5159_v60, %v5130_v43 }
 0x31c   :  { %4450 = vrot.lane.b32.xlu0 %v4449_v58, %s4766_s25  ;;  %4445 = vrot.lane.b32.xlu1 %v4444_v0, %s4766_s25 }
 0x31d   :  { %v5169_v2 = vpop.permute.xlu1 %513  ;;  %v5182_v6 = vpop.permute.xlu0 %531 }
 0x31e   :  { %v5173_v3 = vpack.i.bf16 %v5167_v1, %v5169_v2 }
 0x320   :  { %4460 = vrot.lane.b32.xlu0 %v5173_v3, %s4766_s25 }
 0x321   :  { %v5177_v4 = vpop.permute.xlu1 %503  ;;  %v5192_v53 = vpop.permute.xlu0 %517 }
 0x322   :  { %v4454_v5 = vpack.i.bf16 %v5177_v4, %v5153_v59 }
 0x324   :  { %4455 = vrot.lane.b32.xlu1 %v4454_v5, %s4766_s25 }
 0x325   :  { %v5184_v7 = vpop.permute.xlu1 %529  ;;  %v5206_v17 = vpop.permute.xlu0 %533 }
 0x326   :  { %v5188_v8 = vpack.i.bf16 %v5182_v6, %v5184_v7 }
 0x328   :  { %4465 = vrot.lane.b32.xlu1 %v5188_v8, %s4766_s25 }
 0x329   :  { %v4406_v9 = vpop.permute.xlu1 %4405 }
 0x32a   :  { %v4408_v11 = vunpack.i.h.bf16 %v4406_v9  ;;  %v4407_v12 = vunpack.i.l.bf16 %v4406_v9 }
 0x32c   :  { %v4187_v62 = vpack.c.bf16 %v4408_v11, %v4407_v12 }
 0x32d   :  { %v5194_v14 = vpop.permute.xlu1 %519 }
 0x32e   :  { %4189 = vmatprep.subr.msk.bf16.mxu1 %vm5140_vm3, %v4187_v62  ;;  %v5200_v15 = vpack.i.bf16 %v5194_v14, %v5192_v53 }
 0x32f   :  { %4192 = vmatpush3.bf16.xpose.msk.msra.mxu1 %vm5140_vm3, %v4187_v62 }
 0x330   :  { %4470 = vrot.lane.b32.xlu0 %v5200_v15, %s4766_s25 }
 0x331   :  { %v5208_v18 = vpop.permute.xlu1 %535 }
 0x332   :  { %v5212_v35 = vpack.i.bf16 %v5208_v18, %v5206_v17 }
 0x334   :  { %4480 = vrot.lane.b32.xlu0 %v5054_v19, %s4767_s26  ;;  %4475 = vrot.lane.b32.xlu1 %v5212_v35, %s4766_s25 }
 0x336   :  { %3850 = vmatmul.mubr.msk.f32.vlgmr.msra.gmra.mrb[8].mxu1 %vm545_vm2, %v5025_v10 }
 0x337   :  { %3852 = vmatprep.mubr.msk.f32.mxu1 %vm545_vm2, %v5032_v29 }
 0x338   :  { %4490 = vrot.lane.b32.xlu0 %v5102_v26, %s4767_s26  ;;  %4485 = vrot.lane.b32.xlu1 %v5088_v23, %s4767_s26 }
 0x33a   :  { %3853 = vmatmul.mubr.msk.f32.gmra.mrb[10].mxu1 %vm545_vm2, %v5037_v13 }
 0x33b   :  { %3863 = vmatprep.mubr.msk.f32.mxu1 %vm545_vm2, %v5098_v25 }
 0x33c   :  { %4495 = vrot.lane.b32.xlu0 %v5117_v37, %s4767_s26  ;;  %4500 = vrot.lane.b32.xlu1 %v4419_v41, %s4767_s26 }
 0x340   :  { %4510 = vrot.lane.b32.xlu0 %v4429_v50, %s4767_s26  ;;  %4505 = vrot.lane.b32.xlu1 %v4424_v32, %s4767_s26 }
 0x344   :  { %4515 = vrot.lane.b32.xlu0 %v4434_v49, %s4767_s26  ;;  %4520 = vrot.lane.b32.xlu1 %v4439_v57, %s4767_s26 }
 0x348   :  { %4525 = vrot.lane.b32.xlu0 %v4444_v0, %s4767_s26 }
 0x34c   :  { %4530 = vrot.lane.b32.xlu0 %v4449_v58, %s4767_s26 }
 0x350   :  { %4535 = vrot.lane.b32.xlu0 %v4454_v5, %s4767_s26 }
 0x36e   :  { %v4411_v10 = vpop.permute.xlu0 %4410 }
 0x36f   :  { %v4413_v29 = vunpack.i.h.bf16 %v4411_v10  ;;  %v4412_v13 = vunpack.i.l.bf16 %v4411_v10 }
 0x371   :  { %v4193_v19 = vpack.c.bf16 %v4413_v29, %v4412_v13 }
 0x373   :  { %4195 = vmatprep.subr.msk.bf16.mxu1 %vm5140_vm3, %v4193_v19 }
 0x374   :  { %4198 = vmatpush3.bf16.xpose.msk.msra.mxu1 %vm5140_vm3, %v4193_v19 }
 0x37a   :  { %v4416_v23 = vpop.permute.xlu1 %4415 }
 0x37b   :  { %v4418_v25 = vunpack.i.h.bf16 %v4416_v23  ;;  %v4417_v26 = vunpack.i.l.bf16 %v4416_v23 }
 0x37d   :  { %v4199_v37 = vpack.c.bf16 %v4418_v25, %v4417_v26 }
 0x37e   :  { %v4421_v41 = vpop.permute.xlu0 %4420 }
 0x37f   :  { %v4423_v32 = vunpack.i.h.bf16 %v4421_v41  ;;  %v4422_v46 = vunpack.i.l.bf16 %v4421_v41  ;;  %4201 = vmatprep.subr.msk.bf16.mxu1 %vm5140_vm3, %v4199_v37 }
 0x380   :  { %4204 = vmatpush3.bf16.xpose.msk.msra.mxu1 %vm5140_vm3, %v4199_v37 }
 0x381   :  { %v4205_v47 = vpack.c.bf16 %v4423_v32, %v4422_v46 }
 0x382   :  { %v4426_v48 = vpop.permute.xlu1 %4425 }
 0x383   :  { %v4428_v50 = vunpack.i.h.bf16 %v4426_v48  ;;  %v4427_v55 = vunpack.i.l.bf16 %v4426_v48  ;;  %4207 = vmatprep.subr.msk.bf16.mxu1 %vm5140_vm3, %v4205_v47 }
 0x385   :  { %v4217_v57 = vpack.c.bf16 %v4428_v50, %v4427_v55 }
 0x386   :  { %v4431_v49 = vpop.permute.xlu0 %4430 }
 0x387   :  { %v4433_v58 = vunpack.i.h.bf16 %v4431_v49  ;;  %v4432_v0 = vunpack.i.l.bf16 %v4431_v49  ;;  %3864 = vmatmul.mubr.msk.f32.vlgmr.msra.gmra.mrb[12].mxu1 %vm545_vm2, %v5096_v24  ;;  %4219 = vmatprep.subr.msk.bf16.mxu0 %vm5140_vm3, %v4217_v57 }
 0x388   :  { %3866 = vmatprep.mubr.msk.f32.mxu1 %vm545_vm2, %v5108_v31  ;;  %4210 = vmatpush3.bf16.xpose.msk.msra.mxu1 %vm5140_vm3, %v4205_v47 }
 0x389   :  { %v4211_v5 = vpack.c.bf16 %v4433_v58, %v4432_v0  ;;  %4222 = vmatpush3.bf16.xpose.msk.msra.mxu0 %vm5140_vm3, %v4217_v57 }
 0x38a   :  { %v4436_v9 = vpop.permute.xlu1 %4435  ;;  %v4441_v11 = vpop.permute.xlu0 %4440 }
 0x38b   :  { %v4438_v12 = vunpack.i.h.bf16 %v4436_v9  ;;  %v4437_v62 = vunpack.i.l.bf16 %v4436_v9  ;;  %v4443_v10 = vunpack.i.h.bf16 %v4441_v11  ;;  %v4442_v29 = vunpack.i.l.bf16 %v4441_v11  ;;  %3867 = vmatmul.mubr.msk.f32.gmra.mrb[14].mxu1 %vm545_vm2, %v5111_v36  ;;  %4213 = vmatprep.subr.msk.bf16.mxu1 %vm5140_vm3, %v4211_v5 }
 0x38c   :  { %3877 = vmatprep.mubr.msk.f32.mxu1 %vm545_vm2, %v5106_v30 }
 0x38d   :  { %v4223_v24 = vpack.c.bf16 %v4438_v12, %v4437_v62  ;;  %v4229_v13 = vpack.c.bf16 %v4443_v10, %v4442_v29 }
 0x38e   :  { %v4446_v31 = vpop.permute.xlu1 %4445  ;;  %v4451_v26 = vpop.permute.xlu0 %4450 }
 0x38f   :  { %v4448_v19 = vunpack.i.h.bf16 %v4446_v31  ;;  %v4447_v23 = vunpack.i.l.bf16 %v4446_v31  ;;  %4225 = vmatprep.subr.msk.bf16.mxu0 %vm5140_vm3, %v4223_v24  ;;  %v4453_v30 = vunpack.i.h.bf16 %v4451_v26  ;;  %v4452_v36 = vunpack.i.l.bf16 %v4451_v26 }
 0x390   :  { %4216 = vmatpush3.bf16.xpose.msk.msra.mxu1 %vm5140_vm3, %v4211_v5 }
 0x391   :  { %v4241_v25 = vpack.c.bf16 %v4448_v19, %v4447_v23  ;;  %4228 = vmatpush3.bf16.xpose.msk.msra.mxu0 %vm5140_vm3, %v4223_v24  ;;  %4231 = vmatprep.subr.msk.bf16.mxu1 %vm5140_vm3, %v4229_v13  ;;  %v4235_v46 = vpack.c.bf16 %v4453_v30, %v4452_v36 }
 0x392   :  { %v4461_v47 = vpop.permute.xlu0 %4460 }
 0x393   :  { %4243 = vmatprep.subr.msk.bf16.mxu0 %vm5140_vm3, %v4241_v25 }
 0x396   :  { %v4456_v37 = vpop.permute.xlu1 %4455 }
 0x397   :  { %v4458_v41 = vunpack.i.h.bf16 %v4456_v37  ;;  %v4457_v32 = vunpack.i.l.bf16 %v4456_v37  ;;  %3878 = vmatmul.mubr.msk.f32.vlgmr.msra.gmra.mrb[16].mxu1 %vm545_vm2, %v5121_v38 }
 0x398   :  { %3892 = vmatmul.mubr.msk.f32.vlgmr.msra.gmra.mrb[8].mxu0 %vm545_vm2, %v5128_v42  ;;  %3880 = vmatprep.mubr.msk.f32.mxu1 %vm545_vm2, %v5113_v28  ;;  %v4463_v28 = vunpack.i.h.bf16 %v4461_v47  ;;  %v4462_v42 = vunpack.i.l.bf16 %v4461_v47 }
 0x399   :  { %v4247_v48 = vpack.c.bf16 %v4458_v41, %v4457_v32  ;;  %3894 = vmatprep.mubr.msk.f32.mxu0 %vm545_vm2, %v5123_v39  ;;  %4234 = vmatpush3.bf16.xpose.msk.msra.mxu1 %vm5140_vm3, %v4229_v13  ;;  %v5377_v32 = vld [vmem:[%s6145_s4 + $0x18] sm:$0xff] }
 0x39a   :  { %4246 = vmatpush3.bf16.xpose.msk.msra.mxu0 %vm5140_vm3, %v4241_v25  ;;  %4237 = vmatprep.subr.msk.bf16.mxu1 %vm5140_vm3, %v4235_v46  ;;  %v4466_v38 = vpop.permute.xlu1 %4465  ;;  %v4253_v55 = vpack.c.bf16 %v4463_v28, %v4462_v42  ;;  %v5389_v42 = vld [vmem:[%s6145_s4 + $0x10] sm:$0xff] }
 0x39b   :  { %3881 = vmatmul.mubr.msk.f32.gmra.mrb[18].mxu1 %vm545_vm2, %v5134_v44  ;;  %4249 = vmatprep.subr.msk.bf16.mxu0 %vm5140_vm3, %v4247_v48  ;;  %v4468_v39 = vunpack.i.h.bf16 %v4466_v38  ;;  %v4467_v50 = vunpack.i.l.bf16 %v4466_v38 }
 0x39c   :  { %3895 = vmatmul.mubr.msk.f32.gmra.mrb[10].mxu0 %vm545_vm2, %v5145_v56  ;;  %3905 = vmatprep.mubr.msk.f32.mxu1 %vm545_vm2, %v5047_v16 }
 0x39d   :  { %3919 = vmatprep.mubr.msk.f32.mxu0 %vm545_vm2, %v5130_v43  ;;  %v4265_v57 = vpack.c.bf16 %v4468_v39, %v4467_v50 }
 0x3a1   :  { %4240 = vmatpush3.bf16.xpose.msk.msra.mxu1 %vm5140_vm3, %v4235_v46 }
 0x3a2   :  { %4252 = vmatpush3.bf16.xpose.msk.msra.mxu0 %vm5140_vm3, %v4247_v48  ;;  %4255 = vmatprep.subr.msk.bf16.mxu1 %vm5140_vm3, %v4253_v55  ;;  %v4471_v44 = vpop.permute.xlu0 %4470 }
 0x3a3   :  { %4267 = vmatprep.subr.msk.bf16.mxu0 %vm5140_vm3, %v4265_v57  ;;  %v4473_v16 = vunpack.i.h.bf16 %v4471_v44  ;;  %v4472_v56 = vunpack.i.l.bf16 %v4471_v44  ;;  %v1414_v44 = vld [vmem:[%s6145_s4 + $0x20] sm:$0xff] }
 0x3a5   :  { %v4259_v5 = vpack.c.bf16 %v4473_v16, %v4472_v56 }
 0x3a6   :  { %v4476_v49 = vpop.permute.xlu1 %4475  ;;  %v4481_v58 = vpop.permute.xlu0 %4480 }
 0x3a7   :  { %v4478_v43 = vunpack.i.h.bf16 %v4476_v49  ;;  %v4477_v0 = vunpack.i.l.bf16 %v4476_v49 }
 0x3a8   :  { %3906 = vmatmul.mubr.msk.f32.vlgmr.msra.gmra.mrb[20].mxu1 %vm545_vm2, %v5066_v21  ;;  %v4482_v21 = vunpack.i.l.bf16 %v4481_v58 }
 0x3a9   :  { %v4271_v9 = vpack.c.bf16 %v4478_v43, %v4477_v0  ;;  %3920 = vmatmul.mubr.msk.f32.vlgmr.msra.gmra.mrb[12].mxu0 %vm545_vm2, %v5159_v60  ;;  %3908 = vmatprep.mubr.msk.f32.mxu1 %vm545_vm2, %v5060_v20  ;;  %v4483_v20 = vunpack.i.h.bf16 %v4481_v58 }
 0x3aa   :  { %3922 = vmatprep.mubr.msk.f32.mxu0 %vm545_vm2, %v5153_v59  ;;  %4258 = vmatpush3.bf16.xpose.msk.msra.mxu1 %vm5140_vm3, %v4253_v55  ;;  %v4486_v11 = vpop.permute.xlu1 %4485  ;;  %v4491_v12 = vpop.permute.xlu0 %4490 }
 0x3ab   :  { %4270 = vmatpush3.bf16.xpose.msk.msra.mxu0 %vm5140_vm3, %v4265_v57  ;;  %4261 = vmatprep.subr.msk.bf16.mxu1 %vm5140_vm3, %v4259_v5  ;;  %v4493_v23 = vunpack.i.h.bf16 %v4491_v12  ;;  %v4492_v25 = vunpack.i.l.bf16 %v4491_v12  ;;  %v1415_v57 = vld [vmem:[%s6145_s4 + $0x28] sm:$0xff] }
 0x3ac   :  { %3909 = vmatmul.mubr.msk.f32.gmra.mrb[22].mxu1 %vm545_vm2, %v5076_v22  ;;  %4273 = vmatprep.subr.msk.bf16.mxu0 %vm5140_vm3, %v4271_v9  ;;  %v4277_v22 = vpack.c.bf16 %v4483_v20, %v4482_v21  ;;  %v5420_v20 = vld [vmem:[%s6145_s4 + $0x60] sm:$0xff]  ;;  %v1417_v21 = vld [vmem:[%s6145_s4 + $0x38] sm:$0xff] }
 0x3ad   :  { %3923 = vmatmul.mubr.msk.f32.gmra.mrb[14].mxu0 %vm545_vm2, %v5177_v4  ;;  %3933 = vmatprep.mubr.msk.f32.mxu1 %vm545_vm2, %v5169_v2  ;;  %v4488_v4 = vunpack.i.h.bf16 %v4486_v11 }
 0x3ae   :  { %3947 = vmatprep.mubr.msk.f32.mxu0 %vm545_vm2, %v5184_v7  ;;  %v4501_v59 = vpop.permute.xlu1 %4500  ;;  %v5332_v60 = vpop.permute.xlu0 %4495  ;;  %v4487_v7 = vunpack.i.l.bf16 %v4486_v11  ;;  %v5415_v11 = vld [vmem:[%s6145_s4 + $0x68] sm:$0xff] }
 0x3af   :  { %v4503_v62 = vunpack.i.h.bf16 %v4501_v59  ;;  %v4502_v10 = vunpack.i.l.bf16 %v4501_v59 }
 0x3b0   :  { %v4281_v51 = vpack.c.bf16 %v4488_v4, %v4487_v7 }
 0x3b1   :  { %v4293_v29 = vpack.c.bf16 %v4503_v62, %v4502_v10  ;;  %v1416_v10 = vld [vmem:[%s6145_s4 + $0x30] sm:$0xff] }
 0x3b2   :  { %4264 = vmatpush3.bf16.xpose.msk.msra.mxu1 %vm5140_vm3, %v4259_v5  ;;  %v5336_v24 = vpop.permute.xlu1 %4505  ;;  %v4511_v2 = vpop.permute.xlu0 %4510 }
 0x3b3   :  { %4276 = vmatpush3.bf16.xpose.msk.msra.mxu0 %vm5140_vm3, %v4271_v9  ;;  %4278 = vmatprep.subr.bf16.mxu1 %v4277_v22  ;;  %v4513_v31 = vunpack.i.h.bf16 %v4511_v2  ;;  %v4512_v13 = vunpack.i.l.bf16 %v4511_v2 }
 0x3b4   :  { %4294 = vmatprep.subr.bf16.mxu0 %v4293_v29 }
 0x3b5   :  { %v4297_v36 = vpack.c.bf16 %v4513_v31, %v4512_v13 }
 0x3b6   :  { %v4521_v19 = vpop.permute.xlu1 %4520 }
 0x3b7   :  { %v4523_v26 = vunpack.i.h.bf16 %v4521_v19  ;;  %v4522_v30 = vunpack.i.l.bf16 %v4521_v19 }
 0x3b9   :  { %3934 = vmatmul.mubr.msk.f32.vlgmr.msra.gmra.mrb[24].mxu1 %vm545_vm2, %v5167_v1  ;;  %v5352_v1 = vpack.c.bf16 %v4493_v23, %v4492_v25  ;;  %v5443_v23 = vld [vmem:[%s6145_s4 + $0x78] sm:$0xff] }
 0x3ba   :  { %3948 = vmatmul.mubr.msk.f32.vlgmr.msra.gmra.mrb[16].mxu0 %vm545_vm2, %v5182_v6  ;;  %3936 = vmatprep.mubr.msk.f32.mxu1 %vm545_vm2, %v5192_v53  ;;  %v5354_v6 = vpack.c.bf16 %v4523_v26, %v4522_v30  ;;  %v5361_v53 = vld [vmem:[%s6145_s4 + $0x8] sm:$0xff]  ;;  %v5450_v30 = vld [vmem:[%s6145_s4 + $0x70] sm:$0xff] }
 0x3bb   :  { %3950 = vmatprep.mubr.msk.f32.mxu0 %vm545_vm2, %v5206_v17  ;;  %4280 = vmatpush3.bf16.msra.mxu1 %v4277_v22 }
 0x3bc   :  { %4296 = vmatpush3.bf16.msra.mxu0 %v4293_v29  ;;  %4282 = vmatprep.subr.bf16.mxu1 %v4281_v51 }
 0x3bd   :  { %4298 = vmatprep.subr.bf16.mxu0 %v4297_v36  ;;  %3937 = vmatmul.mubr.msk.f32.gmra.mrb[26].mxu1 %vm545_vm2, %v5194_v14  ;;  %v5366_v14 = vld [vmem:[%s6145_s4] sm:$0xff] }
 0x3be   :  { %3951 = vmatmul.mubr.msk.f32.gmra.mrb[18].mxu0 %vm545_vm2, %v5208_v18 }
 0x3bf   :  { %4284 = vmatpush3.bf16.msra.mxu1 %v4281_v51 }
 0x3c0   :  { %4300 = vmatpush3.bf16.msra.mxu0 %v4297_v36  ;;  %4286 = vmatprep.subr.bf16.mxu1 %v5352_v1 }
 0x3c1   :  { %4310 = vmatprep.subr.bf16.mxu0 %v5354_v6 }
 0x409   :  { %v3851_v17 = vpop.f32.mrb[8].mxu1 }
 0x40a   :  { %v5369_v18 = vadd.f32 %v3851_v17, %v5361_v53  ;;  %v628_v37 = vpop.f32.mrb[9].mxu1 }
 0x40b   :  { %v5372_v41 = vadd.f32 %v5366_v14, %v628_v37  ;;  %v5460_v37 = vld [vmem:[%s6145_s4 + $0x48] sm:$0xff] }
 0x40c   :  { %v1461_v46 = vsel %vm199_vm1, %v5369_v18, -inf }
 0x40d   :  { %1462 = vmax.xlane.f32.xlu1 %v1461_v46  ;;  %v3854_v47 = vpop.f32.mrb[10].mxu1  ;;  %v1458_v48 = vsel %vm199_vm1, %v5372_v41, -inf }
 0x40e   :  { %v5384_v38 = vadd.f32 %v3854_v47, %v5377_v32  ;;  %1459 = vmax.xlane.f32.xlu0 %v1458_v48  ;;  %v638_v28 = vpop.f32.mrb[11].mxu1  ;;  %v5470_v48 = vld [vmem:[%s6145_s4 + $0x40] sm:$0xff] }
 0x40f   :  { %v5394_v50 = vadd.f32 %v5389_v42, %v638_v28 }
 0x410   :  { %v1467_v39 = vsel %vm199_vm1, %v5384_v38, -inf }
 0x411   :  { %v1464_v55 = vsel %vm199_vm1, %v5394_v50, -inf }
 0x412   :  { %1468 = vmax.xlane.f32.xlu0 %v1467_v39 }
 0x416   :  { %1465 = vmax.xlane.f32.xlu0 %v1464_v55 }
 0x45a   :  { %v3865_v16 = vpop.f32.mrb[12].mxu1 }
 0x45b   :  { %v5404_v56 = vadd.f32 %v3865_v16, %v1415_v57  ;;  %v737_v49 = vpop.f32.mrb[13].mxu1 }
 0x45c   :  { %v5406_v58 = vadd.f32 %v1414_v44, %v737_v49 }
 0x45d   :  { %v1473_v43 = vsel %vm199_vm1, %v5404_v56, -inf }
 0x45e   :  { %1474 = vmax.xlane.f32.xlu1 %v1473_v43  ;;  %v3868_v0 = vpop.f32.mrb[14].mxu1  ;;  %v1470_v5 = vsel %vm199_vm1, %v5406_v58, -inf }
 0x45f   :  { %1471 = vmax.xlane.f32.xlu0 %v1470_v5  ;;  %v747_v9 = vpop.f32.mrb[15].mxu1  ;;  %v5434_v4 = vadd.f32 %v3868_v0, %v1417_v21  ;;  %v5489_v5 = vld [vmem:[%s6145_s4 + $0x58] sm:$0xff] }
 0x460   :  { %v5438_v13 = vadd.f32 %v1416_v10, %v747_v9 }
 0x461   :  { %v1479_v17 = vsel %vm199_vm1, %v5434_v4, -inf }
 0x462   :  { %v1476_v47 = vsel %vm199_vm1, %v5438_v13, -inf }
 0x46a   :  { %v3879_v12 = vpop.f32.mrb[16].mxu1 }
 0x46b   :  { %v3893_v59 = vpop.f32.mrb[8].mxu0  ;;  %v846_v62 = vpop.f32.mrb[17].mxu1  ;;  %v5473_v28 = vadd.f32 %v3879_v12, %v5460_v37 }
 0x46c   :  { %v5429_v22 = vadd.f32 %v3893_v59, %v5415_v11  ;;  %v955_v29 = vpop.f32.mrb[9].mxu0  ;;  %v5478_v55 = vadd.f32 %v5470_v48, %v846_v62  ;;  %v5494_v59 = vld [vmem:[%s6145_s4 + $0x50] sm:$0xff] }
 0x46d   :  { %v5432_v2 = vadd.f32 %v5420_v20, %v955_v29  ;;  %v1485_v49 = vsel %vm199_vm1, %v5473_v28, -inf }
 0x46e   :  { %v1497_v7 = vsel %vm199_vm1, %v5429_v22, -inf  ;;  %v3882_v31 = vpop.f32.mrb[18].mxu1  ;;  %v1482_v0 = vsel %vm199_vm1, %v5478_v55, -inf }
 0x46f   :  { %v3896_v19 = vpop.f32.mrb[10].mxu0  ;;  %1498 = vmax.xlane.f32.xlu1 %v1497_v7  ;;  %v1494_v25 = vsel %vm199_vm1, %v5432_v2, -inf  ;;  %v856_v51 = vpop.f32.mrb[19].mxu1 }
 0x470   :  { %v965_v26 = vpop.f32.mrb[11].mxu0  ;;  %1495 = vmax.xlane.f32.xlu0 %v1494_v25  ;;  %v5453_v36 = vadd.f32 %v3896_v19, %v5443_v23  ;;  %v5501_v19 = vadd.f32 %v3882_v31, %v5489_v5 }
 0x471   :  { %v5463_v46 = vadd.f32 %v5450_v30, %v965_v26 }
 0x472   :  { %v1503_v39 = vsel %vm199_vm1, %v5453_v36, -inf  ;;  %v1491_v31 = vsel %vm199_vm1, %v5501_v19, -inf }
 0x473   :  { %1480 = vmax.xlane.f32.xlu1 %v1479_v17  ;;  %v1500_v16 = vsel %vm199_vm1, %v5463_v46, -inf  ;;  %v5506_v17 = vadd.f32 %v5494_v59, %v856_v51 }
 0x474   :  { %1477 = vmax.xlane.f32.xlu0 %v1476_v47 }
 0x475   :  { %v1488_v51 = vsel %vm199_vm1, %v5506_v17, -inf }
 0x477   :  { %1504 = vmax.xlane.f32.xlu1 %v1503_v39 }
 0x478   :  { %1501 = vmax.xlane.f32.xlu0 %v1500_v16 }
 0x47b   :  { %1486 = vmax.xlane.f32.xlu1 %v1485_v49  ;;  %v3907_v43 = vpop.f32.mrb[20].mxu1  ;;  %v5514_v49 = vpop.permute.xlu0 %4515 }
 0x47c   :  { %v3921_v9 = vpop.f32.mrb[12].mxu0  ;;  %1483 = vmax.xlane.f32.xlu0 %v1482_v0  ;;  %v1064_v12 = vpop.f32.mrb[21].mxu1 }
 0x47d   :  { %v5496_v62 = vadd.f32 %v3921_v9, %v1415_v57  ;;  %v1173_v29 = vpop.f32.mrb[13].mxu0  ;;  %v5521_v9 = vadd.f32 %v3907_v43, %v5361_v53 }
 0x47e   :  { %v5498_v7 = vadd.f32 %v1414_v44, %v1173_v29 }
 0x47f   :  { %v1521_v25 = vsel %vm199_vm1, %v5496_v62, -inf  ;;  %v3910_v26 = vpop.f32.mrb[22].mxu1 }
 0x480   :  { %v3924_v47 = vpop.f32.mrb[14].mxu0  ;;  %1522 = vmax.xlane.f32.xlu1 %v1521_v25  ;;  %v1518_v39 = vsel %vm199_vm1, %v5498_v7, -inf  ;;  %v1074_v57 = vpop.f32.mrb[23].mxu1 }
 0x481   :  { %v1183_v16 = vpop.f32.mrb[15].mxu0  ;;  %1519 = vmax.xlane.f32.xlu0 %v1518_v39  ;;  %v5510_v44 = vadd.f32 %v3924_v47, %v1417_v21  ;;  %v5526_v21 = vadd.f32 %v5366_v14, %v1064_v12  ;;  %v1509_v47 = vsel %vm199_vm1, %v5521_v9, -inf  ;;  %v5550_v61 = vadd.f32 %v5389_v42, %v1074_v57 }
 0x482   :  { %v5516_v0 = vadd.f32 %v1416_v10, %v1183_v16  ;;  %v5530_v10 = vpop.permute.xlu0 %4525 }
 0x483   :  { %v1527_v29 = vsel %vm199_vm1, %v5510_v44, -inf  ;;  %v1506_v53 = vsel %vm199_vm1, %v5526_v21, -inf  ;;  %v1512_v42 = vsel %vm199_vm1, %v5550_v61, -inf }
 0x484   :  { %1492 = vmax.xlane.f32.xlu1 %v1491_v31  ;;  %v1524_v25 = vsel %vm199_vm1, %v5516_v0, -inf }
 0x485   :  { %1489 = vmax.xlane.f32.xlu0 %v1488_v51 }
 0x486   :  { %v5542_v51 = vpop.permute.xlu0 %4530 }
 0x488   :  { %1528 = vmax.xlane.f32.xlu1 %v1527_v29  ;;  %v5545_v29 = vadd.f32 %v3910_v26, %v5377_v32 }
 0x489   :  { %1525 = vmax.xlane.f32.xlu0 %v1524_v25 }
 0x48a   :  { %v1515_v32 = vsel %vm199_vm1, %v5545_v29, -inf  ;;  %v5564_v57 = vpop.permute.xlu0 %4535 }
 0x48c   :  { %1510 = vmax.xlane.f32.xlu1 %v1509_v47  ;;  %v3935_v39 = vpop.f32.mrb[24].mxu1 }
 0x48d   :  { %v3949_v43 = vpop.f32.mrb[16].mxu0  ;;  %1507 = vmax.xlane.f32.xlu0 %v1506_v53  ;;  %v1282_v16 = vpop.f32.mrb[25].mxu1 }
 0x48e   :  { %v5537_v14 = vadd.f32 %v3949_v43, %v5415_v11  ;;  %v1391_v12 = vpop.f32.mrb[17].mxu0 }
 0x48f   :  { %v5540_v31 = vadd.f32 %v5420_v20, %v1391_v12 }
 0x490   :  { %v1545_v25 = vsel %vm199_vm1, %v5537_v14, -inf  ;;  %v3938_v47 = vpop.f32.mrb[26].mxu1 }
 0x491   :  { %v3952_v53 = vpop.f32.mrb[18].mxu0  ;;  %1546 = vmax.xlane.f32.xlu1 %v1545_v25  ;;  %v1542_v11 = vsel %vm199_vm1, %v5540_v31, -inf  ;;  %v1292_v43 = vpop.f32.mrb[27].mxu1 }
 0x492   :  { %v1401_v20 = vpop.f32.mrb[19].mxu0  ;;  %1543 = vmax.xlane.f32.xlu0 %v1542_v11  ;;  %v5555_v12 = vadd.f32 %v3952_v53, %v5443_v23 }
 0x493   :  { %v5560_v26 = vadd.f32 %v5450_v30, %v1401_v20 }
 0x494   :  { %v1551_v25 = vsel %vm199_vm1, %v5555_v12, -inf }
 0x495   :  { %1516 = vmax.xlane.f32.xlu1 %v1515_v32  ;;  %v1548_v23 = vsel %vm199_vm1, %v5560_v26, -inf }
 0x496   :  { %1513 = vmax.xlane.f32.xlu0 %v1512_v42 }
 0x499   :  { %1552 = vmax.xlane.f32.xlu1 %v1551_v25 }
 0x49a   :  { %1549 = vmax.xlane.f32.xlu0 %v1548_v23  ;;  %v1463_v53 = vpop.xlane.xlu1 %1462 }
 0x49b   :  { %v1555_v11 = vsub.f32 %v5369_v18, %v1463_v53  ;;  %v1460_v30 = vpop.xlane.xlu0 %1459 }
 0x49c   :  { %v1554_v20 = vsub.f32 %v5372_v41, %v1460_v30 }
 0x49d   :  { %v1588_v32 = vmul.f32 1.442695, %v1555_v11 }
 0x49e   :  { %v1586_v63 = vmul.f32 1.442695, %v1554_v20 }
 0x49f   :  { %4575 = vpow2.f32 %v1588_v32  ;;  %v1469_v42 = vpop.xlane.xlu0 %1468 }
 0x4a0   :  { %4577 = vpow2.f32 %v1586_v63  ;;  %v1557_v52 = vsub.f32 %v5384_v38, %v1469_v42 }
 0x4a2   :  { %v1592_v54 = vmul.f32 1.442695, %v1557_v52  ;;  %v5585_v52 = vadd.f32 %v3935_v39, %v5460_v37  ;;  %v5602_v37 = vadd.f32 %v5494_v59, %v1292_v43 }
 0x4a3   :  { %v1466_v40 = vpop.xlane.xlu0 %1465 }
 0x4a4   :  { %4579 = vpow2.f32 %v1592_v54  ;;  %v1556_v25 = vsub.f32 %v5394_v50, %v1466_v40  ;;  %v5592_v54 = vadd.f32 %v5470_v48, %v1282_v16  ;;  %v5595_v50 = vadd.f32 %v3938_v47, %v5489_v5 }
 0x4a5   :  { %v1533_v11 = vsel %vm199_vm1, %v5585_v52, -inf  ;;  %v1536_v5 = vsel %vm199_vm1, %v5602_v37, -inf }
 0x4a6   :  { %v1590_v45 = vmul.f32 1.442695, %v1556_v25  ;;  %v1530_v39 = vsel %vm199_vm1, %v5592_v54, -inf  ;;  %v1539_v48 = vsel %vm199_vm1, %v5595_v50, -inf }
 0x4a8   :  { %4581 = vpow2.f32 %v1590_v45 }
 0x4a9   :  { %v5574_v23 = vpop.eup %4575 }
 0x4aa   :  { %v5576_v18 = vpop.eup %4577  ;;  %v1653_v41 = vsel %vm199_vm1, %v5574_v23, 0.0 }
 0x4ab   :  { %1654 = vadd.xlane.f32.xlu1 %v1653_v41  ;;  %v1650_v63 = vsel %vm199_vm1, %v5576_v18, 0.0 }
 0x4ac   :  { %1651 = vadd.xlane.f32.xlu0 %v1650_v63 }
 0x4ae   :  { %v5582_v38 = vpop.eup %4579 }
 0x4af   :  { %v1659_v40 = vsel %vm199_vm1, %v5582_v38, 0.0 }
 0x4b0   :  { %1660 = vadd.xlane.f32.xlu1 %v1659_v40 }
 0x4b2   :  { %v5589_v45 = vpop.eup %4581 }
 0x4b3   :  { %v1656_v53 = vsel %vm199_vm1, %v5589_v45, 0.0 }
 0x4b4   :  { %1657 = vadd.xlane.f32.xlu0 %v1656_v53  ;;  %1534 = vmax.xlane.f32.xlu1 %v1533_v11 }
 0x4b8   :  { %1531 = vmax.xlane.f32.xlu0 %v1530_v39  ;;  %1540 = vmax.xlane.f32.xlu1 %v1539_v48 }
 0x4bc   :  { %1537 = vmax.xlane.f32.xlu0 %v1536_v5 }
 0x4c9   :  { %4545 = vrot.lane.b32.xlu1 %v5188_v8, %s4767_s26 }
 0x4d2   :  { %4540 = vrot.lane.b32.xlu0 %v5173_v3, %s4767_s26 }
 0x4eb   :  { %v1475_v59 = vpop.xlane.xlu1 %1474 }
 0x4ec   :  { %v1559_v16 = vsub.f32 %v5404_v56, %v1475_v59  ;;  %v1472_v47 = vpop.xlane.xlu0 %1471 }
 0x4ed   :  { %v1558_v43 = vsub.f32 %v5406_v58, %v1472_v47 }
 0x4ee   :  { %v1596_v30 = vmul.f32 1.442695, %v1559_v16 }
 0x4ef   :  { %v1594_v20 = vmul.f32 1.442695, %v1558_v43 }
 0x4f0   :  { %4583 = vpow2.f32 %v1596_v30 }
 0x4f1   :  { %4585 = vpow2.f32 %v1594_v20 }
 0x4fa   :  { %v5616_v32 = vpop.eup %4583 }
 0x4fb   :  { %v5618_v42 = vpop.eup %4585  ;;  %v1665_v8 = vsel %vm199_vm1, %v5616_v32, 0.0 }
 0x4fc   :  { %v1499_v25 = vpop.xlane.xlu1 %1498  ;;  %1666 = vadd.xlane.f32.xlu1 %v1665_v8  ;;  %v1662_v3 = vsel %vm199_vm1, %v5618_v42, 0.0 }
 0x4fd   :  { %v1567_v56 = vsub.f32 %v5429_v22, %v1499_v25  ;;  %v1496_v41 = vpop.xlane.xlu0 %1495  ;;  %1663 = vadd.xlane.f32.xlu0 %v1662_v3 }
 0x4fe   :  { %v1566_v58 = vsub.f32 %v5432_v2, %v1496_v41 }
 0x4ff   :  { %v1612_v63 = vmul.f32 1.442695, %v1567_v56 }
 0x500   :  { %v1610_v40 = vmul.f32 1.442695, %v1566_v58  ;;  %v1481_v53 = vpop.xlane.xlu1 %1480 }
 0x501   :  { %4587 = vpow2.f32 %v1612_v63  ;;  %v1561_v11 = vsub.f32 %v5434_v4, %v1481_v53  ;;  %v1478_v39 = vpop.xlane.xlu0 %1477 }
 0x502   :  { %4589 = vpow2.f32 %v1610_v40  ;;  %v1560_v48 = vsub.f32 %v5438_v13, %v1478_v39 }
 0x503   :  { %v1600_v5 = vmul.f32 1.442695, %v1561_v11 }
 0x504   :  { %v1598_v59 = vmul.f32 1.442695, %v1560_v48  ;;  %v1505_v16 = vpop.xlane.xlu1 %1504 }
 0x505   :  { %4591 = vpow2.f32 %v1600_v5  ;;  %v1569_v22 = vsub.f32 %v5453_v36, %v1505_v16  ;;  %v1502_v47 = vpop.xlane.xlu0 %1501 }
 0x506   :  { %4593 = vpow2.f32 %v1598_v59  ;;  %v1568_v2 = vsub.f32 %v5463_v46, %v1502_v47 }
 0x507   :  { %v1616_v43 = vmul.f32 1.442695, %v1569_v22 }
 0x508   :  { %v1614_v30 = vmul.f32 1.442695, %v1568_v2  ;;  %v1487_v20 = vpop.xlane.xlu1 %1486 }
 0x509   :  { %4595 = vpow2.f32 %v1616_v43  ;;  %v1563_v4 = vsub.f32 %v5473_v28, %v1487_v20  ;;  %v1484_v8 = vpop.xlane.xlu0 %1483 }
 0x50a   :  { %4597 = vpow2.f32 %v1614_v30  ;;  %v1562_v56 = vsub.f32 %v5478_v55, %v1484_v8 }
 0x50b   :  { %v5631_v25 = vpop.eup %4587  ;;  %v1604_v13 = vmul.f32 1.442695, %v1563_v4 }
 0x50c   :  { %v5633_v3 = vpop.eup %4589  ;;  %v1689_v36 = vsel %vm199_vm1, %v5631_v25, 0.0  ;;  %v1602_v55 = vmul.f32 1.442695, %v1562_v56 }
 0x50d   :  { %v1523_v41 = vpop.xlane.xlu1 %1522  ;;  %1690 = vadd.xlane.f32.xlu1 %v1689_v36  ;;  %v1686_v46 = vsel %vm199_vm1, %v5633_v3, 0.0  ;;  %4599 = vpow2.f32 %v1604_v13 }
 0x50e   :  { %v1575_v58 = vsub.f32 %v5496_v62, %v1523_v41  ;;  %v1520_v28 = vpop.xlane.xlu0 %1519  ;;  %1687 = vadd.xlane.f32.xlu0 %v1686_v46 }
 0x50f   :  { %v5641_v63 = vpop.eup %4591  ;;  %v1574_v40 = vsub.f32 %v5498_v7, %v1520_v28 }
 0x510   :  { %v5644_v53 = vpop.eup %4593  ;;  %v1628_v11 = vmul.f32 1.442695, %v1575_v58  ;;  %v1671_v39 = vsel %vm199_vm1, %v5641_v63, 0.0 }
 0x511   :  { %v1493_v48 = vpop.xlane.xlu1 %1492  ;;  %1672 = vadd.xlane.f32.xlu1 %v1671_v39  ;;  %v1668_v5 = vsel %vm199_vm1, %v5644_v53, 0.0  ;;  %v1626_v7 = vmul.f32 1.442695, %v1574_v40 }
 0x512   :  { %4601 = vpow2.f32 %v1628_v11  ;;  %v1565_v62 = vsub.f32 %v5501_v19, %v1493_v48  ;;  %v1490_v59 = vpop.xlane.xlu0 %1489  ;;  %1669 = vadd.xlane.f32.xlu0 %v1668_v5 }
 0x513   :  { %v5651_v16 = vpop.eup %4595  ;;  %4603 = vpow2.f32 %v1602_v55  ;;  %v1564_v47 = vsub.f32 %v5506_v17, %v1490_v59 }
 0x514   :  { %v1608_v22 = vmul.f32 1.442695, %v1565_v62  ;;  %v1695_v2 = vsel %vm199_vm1, %v5651_v16, 0.0  ;;  %v5656_v43 = vpop.eup %4597 }
 0x515   :  { %v1529_v30 = vpop.xlane.xlu1 %1528  ;;  %1696 = vadd.xlane.f32.xlu1 %v1695_v2  ;;  %v1606_v4 = vmul.f32 1.442695, %v1564_v47  ;;  %v1692_v56 = vsel %vm199_vm1, %v5656_v43, 0.0 }
 0x516   :  { %4605 = vpow2.f32 %v1608_v22  ;;  %v1577_v20 = vsub.f32 %v5510_v44, %v1529_v30  ;;  %v1526_v19 = vpop.xlane.xlu0 %1525 }
 0x517   :  { %4607 = vpow2.f32 %v1626_v7  ;;  %v1576_v13 = vsub.f32 %v5516_v0, %v1526_v19  ;;  %v5662_v17 = vpop.eup %4599 }
 0x518   :  { %v1632_v8 = vmul.f32 1.442695, %v1577_v20  ;;  %v1677_v0 = vsel %vm199_vm1, %v5662_v17, 0.0 }
 0x519   :  { %v1511_v36 = vpop.xlane.xlu1 %1510  ;;  %1693 = vadd.xlane.f32.xlu1 %v1692_v56  ;;  %v1630_v44 = vmul.f32 1.442695, %v1576_v13 }
 0x51a   :  { %4609 = vpow2.f32 %v1632_v8  ;;  %v1508_v41 = vpop.xlane.xlu0 %1507  ;;  %v1571_v28 = vsub.f32 %v5521_v9, %v1511_v36 }
 0x51b   :  { %v1570_v46 = vsub.f32 %v5526_v21, %v1508_v41  ;;  %4611 = vpow2.f32 %v1606_v4 }
 0x51c   :  { %v5665_v58 = vpop.eup %4601  ;;  %v1620_v5 = vmul.f32 1.442695, %v1571_v28 }
 0x51d   :  { %v1618_v40 = vmul.f32 1.442695, %v1570_v46  ;;  %1678 = vadd.xlane.f32.xlu1 %v1677_v0  ;;  %v1713_v55 = vsel %vm199_vm1, %v5665_v58, 0.0  ;;  %v5672_v11 = vpop.eup %4603 }
 0x51e   :  { %v1547_v39 = vpop.xlane.xlu1 %1546  ;;  %1714 = vadd.xlane.f32.xlu0 %v1713_v55  ;;  %v1674_v7 = vsel %vm199_vm1, %v5672_v11, 0.0 }
 0x51f   :  { %4613 = vpow2.f32 %v1618_v40  ;;  %v1544_v21 = vpop.xlane.xlu0 %1543  ;;  %v1583_v9 = vsub.f32 %v5537_v14, %v1547_v39 }
 0x520   :  { %v5674_v48 = vpop.eup %4605  ;;  %4615 = vpow2.f32 %v1630_v44  ;;  %v1582_v20 = vsub.f32 %v5540_v31, %v1544_v21 }
 0x521   :  { %v5677_v62 = vpop.eup %4607  ;;  %v1683_v59 = vsel %vm199_vm1, %v5674_v48, 0.0  ;;  %4617 = vpow2.f32 %v1620_v5  ;;  %v1644_v30 = vmul.f32 1.442695, %v1583_v9 }
 0x522   :  { %v1517_v22 = vpop.xlane.xlu1 %1516  ;;  %1684 = vadd.xlane.f32.xlu1 %v1683_v59  ;;  %1675 = vadd.xlane.f32.xlu0 %v1674_v7  ;;  %v1710_v19 = vsel %vm199_vm1, %v5677_v62, 0.0  ;;  %v1642_v36 = vmul.f32 1.442695, %v1582_v20 }
 0x523   :  { %v1514_v47 = vpop.xlane.xlu0 %1513  ;;  %4619 = vpow2.f32 %v1644_v30  ;;  %v1573_v41 = vsub.f32 %v5545_v29, %v1517_v22 }
 0x524   :  { %v5683_v2 = vpop.eup %4609  ;;  %v1572_v29 = vsub.f32 %v5550_v61, %v1514_v47 }
 0x525   :  { %v1719_v14 = vsel %vm199_vm1, %v5683_v2, 0.0  ;;  %v5690_v4 = vpop.eup %4611  ;;  %v1624_v55 = vmul.f32 1.442695, %v1573_v41 }
 0x526   :  { %v1553_v8 = vpop.xlane.xlu1 %1552  ;;  %1720 = vadd.xlane.f32.xlu1 %v1719_v14  ;;  %1711 = vadd.xlane.f32.xlu0 %v1710_v19  ;;  %v1680_v28 = vsel %vm199_vm1, %v5690_v4, 0.0  ;;  %v1622_v21 = vmul.f32 1.442695, %v1572_v29 }
 0x527   :  { %v1585_v13 = vsub.f32 %v5555_v12, %v1553_v8  ;;  %v1550_v56 = vpop.xlane.xlu0 %1549 }
 0x528   :  { %v1584_v31 = vsub.f32 %v5560_v26, %v1550_v56 }
 0x529   :  { %v5695_v46 = vpop.eup %4613  ;;  %v1648_v44 = vmul.f32 1.442695, %v1585_v13 }
 0x52a   :  { %v5699_v0 = vpop.eup %4615  ;;  %v1646_v40 = vmul.f32 1.442695, %v1584_v31  ;;  %1681 = vadd.xlane.f32.xlu1 %v1680_v28  ;;  %v1698_v12 = vsel %vm199_vm1, %v5695_v46, 0.0 }
 0x52b   :  { %4621 = vpow2.f32 %v1648_v44  ;;  %1699 = vadd.xlane.f32.xlu0 %v1698_v12  ;;  %v1716_v26 = vsel %vm199_vm1, %v5699_v0, 0.0  ;;  %v5706_v39 = vpop.eup %4617  ;;  %v4498_v12 = vunpack.i.h.bf16 %v5332_v60 }
 0x52c   :  { %4623 = vpow2.f32 %v1642_v36  ;;  %v1701_v5 = vsel %vm199_vm1, %v5706_v39, 0.0 }
 0x52d   :  { %4625 = vpow2.f32 %v1646_v40  ;;  %v5710_v9 = vpop.eup %4619 }
 0x52e   :  { %1717 = vadd.xlane.f32.xlu1 %v1716_v26  ;;  %4627 = vpow2.f32 %v1624_v55  ;;  %v1737_v61 = vsel %vm199_vm1, %v5710_v9, 0.0  ;;  %v4497_v55 = vunpack.i.l.bf16 %v5332_v60  ;;  %v4507_v60 = vunpack.i.l.bf16 %v5336_v24 }
 0x52f   :  { %4629 = vpow2.f32 %v1622_v21 }
 0x532   :  { %1702 = vadd.xlane.f32.xlu1 %v1701_v5 }
 0x535   :  { %v5712_v59 = vpop.eup %4621 }
 0x536   :  { %v5716_v7 = vpop.eup %4623  ;;  %1738 = vadd.xlane.f32.xlu1 %v1737_v61  ;;  %v1743_v22 = vsel %vm199_vm1, %v5712_v59, 0.0 }
 0x537   :  { %v5720_v47 = vpop.eup %4625  ;;  %1744 = vadd.xlane.f32.xlu0 %v1743_v22  ;;  %v1734_v20 = vsel %vm199_vm1, %v5716_v7, 0.0 }
 0x538   :  { %v1655_v30 = vpop.xlane.xlu1 %1654  ;;  %v5724_v19 = vpop.eup %4627  ;;  %v1740_v8 = vsel %vm199_vm1, %v5720_v47, 0.0 }
 0x539   :  { %4631 = vrcp.f32 %v1655_v30  ;;  %v1652_v14 = vpop.xlane.xlu0 %1651  ;;  %v1707_v13 = vsel %vm199_vm1, %v5724_v19, 0.0  ;;  %v5730_v36 = vpop.eup %4629 }
 0x53a   :  { %1735 = vadd.xlane.f32.xlu1 %v1734_v20  ;;  %4633 = vrcp.f32 %v1652_v14  ;;  %v1704_v41 = vsel %vm199_vm1, %v5730_v36, 0.0  ;;  %v4508_v14 = vunpack.i.h.bf16 %v5336_v24 }
 0x53b   :  { %1741 = vadd.xlane.f32.xlu0 %v1740_v8 }
 0x53d   :  { %v1661_v56 = vpop.xlane.xlu1 %1660 }
 0x53e   :  { %1708 = vadd.xlane.f32.xlu1 %v1707_v13  ;;  %4635 = vrcp.f32 %v1661_v56 }
 0x541   :  { %v1658_v31 = vpop.xlane.xlu0 %1657  ;;  %v1535_v44 = vpop.xlane.xlu1 %1534 }
 0x542   :  { %1705 = vadd.xlane.f32.xlu1 %v1704_v41  ;;  %4637 = vrcp.f32 %v1658_v31  ;;  %v1579_v28 = vsub.f32 %v5585_v52, %v1535_v44  ;;  %v4289_v52 = vpack.c.bf16 %v4498_v12, %v4497_v55  ;;  %v4301_v41 = vpack.c.bf16 %v4508_v14, %v4507_v60 }
 0x543   :  { %v4632_v40 = vpop.eup %4631 }
 0x544   :  { %v4634_v29 = vpop.eup %4633  ;;  %v1636_v26 = vmul.f32 1.442695, %v1579_v28  ;;  %v1779_v22 = vmul.f32 %v4632_v40, %v5574_v23 }
 0x545   :  { %v1532_v21 = vpop.xlane.xlu0 %1531  ;;  %v1541_v5 = vpop.xlane.xlu1 %1540  ;;  %v1778_v61 = vmul.f32 %v4634_v29, %v5576_v18 }
 0x546   :  { %4639 = vpow2.f32 %v1636_v26  ;;  %v1578_v30 = vsub.f32 %v5592_v54, %v1532_v21  ;;  %v1581_v20 = vsub.f32 %v5595_v50, %v1541_v5 }
 0x547   :  { %3961 = vmatprep.mubr.msk.f32.mxu1 %vm199_vm1, %v1778_v61 }
 0x548   :  { %v1634_v8 = vmul.f32 1.442695, %v1578_v30  ;;  %v1640_v13 = vmul.f32 1.442695, %v1581_v20  ;;  %3962 = vmatmul.mubr.msk.f32.vlgmr.msra.gmra.mrb[28].mxu1 %vm199_vm1, %v1779_v22  ;;  %v4636_v54 = vpop.eup %4635  ;;  %v4518_v22 = vunpack.i.h.bf16 %v5514_v49  ;;  %v4517_v30 = vunpack.i.l.bf16 %v5514_v49 }
 0x549   :  { %4288 = vmatpush3.bf16.msra.mxu1 %v5352_v1  ;;  %v1538_v18 = vpop.xlane.xlu0 %1537  ;;  %v1781_v24 = vmul.f32 %v4636_v54, %v5582_v38  ;;  %v5771_v55 = vpop.permute.xlu1 %4545 }
 0x54a   :  { %4641 = vpow2.f32 %v1634_v8  ;;  %4290 = vmatprep.subr.bf16.mxu1 %v4289_v52  ;;  %v1580_v23 = vsub.f32 %v5602_v37, %v1538_v18  ;;  %v4305_v14 = vpack.c.bf16 %v4518_v22, %v4517_v30 }
 0x54b   :  { %4643 = vpow2.f32 %v1640_v13 }
 0x54c   :  { %v4638_v50 = vpop.eup %4637  ;;  %v1638_v56 = vmul.f32 1.442695, %v1580_v23 }
 0x54d   :  { %4292 = vmatpush3.bf16.msra.mxu1 %v4289_v52  ;;  %v1780_v31 = vmul.f32 %v4638_v50, %v5589_v45  ;;  %v5773_v29 = vpop.permute.xlu0 %4540  ;;  %v4527_v52 = vunpack.i.l.bf16 %v5530_v10 }
 0x54e   :  { %4645 = vpow2.f32 %v1638_v56  ;;  %4302 = vmatprep.subr.bf16.mxu1 %v4301_v41 }
 0x54f   :  { %3964 = vmatprep.mubr.msk.f32.mxu1 %vm199_vm1, %v1780_v31 }
 0x550   :  { %v5750_v1 = vpop.eup %4639  ;;  %3965 = vmatmul.mubr.msk.f32.gmra.mrb[30].mxu1 %vm199_vm1, %v1781_v24 }
 0x551   :  { %v1725_v37 = vsel %vm199_vm1, %v5750_v1, 0.0 }
 0x552   :  { %1726 = vadd.xlane.f32.xlu0 %v1725_v37 }
 0x554   :  { %v5755_v44 = vpop.eup %4641 }
 0x555   :  { %v1722_v28 = vsel %vm199_vm1, %v5755_v44, 0.0  ;;  %v5759_v45 = vpop.eup %4643 }
 0x556   :  { %1723 = vadd.xlane.f32.xlu1 %v1722_v28  ;;  %v1731_v38 = vsel %vm199_vm1, %v5759_v45, 0.0  ;;  %v4538_v28 = vunpack.i.h.bf16 %v5564_v57 }
 0x558   :  { %v5761_v40 = vpop.eup %4645 }
 0x559   :  { %v1728_v12 = vsel %vm199_vm1, %v5761_v40, 0.0 }
 0x55a   :  { %1732 = vadd.xlane.f32.xlu1 %v1731_v38  ;;  %1729 = vadd.xlane.f32.xlu0 %v1728_v12  ;;  %v4537_v38 = vunpack.i.l.bf16 %v5564_v57 }
 0x56b   :  { %4555 = vrot.lane.b32.xlu1 %v5212_v35, %s4767_s26 }
 0x570   :  { %4550 = vrot.lane.b32.xlu0 %v5200_v15, %s4767_s26  ;;  %v4528_v15 = vunpack.i.h.bf16 %v5530_v10 }
 0x572   :  { %v4317_v13 = vpack.c.bf16 %v4528_v15, %v4527_v52  ;;  %v4533_v52 = vunpack.i.h.bf16 %v5542_v51 }
 0x589   :  { %v1667_v26 = vpop.xlane.xlu1 %1666 }
 0x58a   :  { %4647 = vrcp.f32 %v1667_v26  ;;  %v1664_v21 = vpop.xlane.xlu0 %1663 }
 0x58b   :  { %4649 = vrcp.f32 %v1664_v21 }
 0x594   :  { %v4648_v5 = vpop.eup %4647 }
 0x595   :  { %v4650_v61 = vpop.eup %4649  ;;  %v1783_v35 = vmul.f32 %v4648_v5, %v5616_v32  ;;  %v4548_v5 = vunpack.i.h.bf16 %v5771_v55 }
 0x596   :  { %v1782_v20 = vmul.f32 %v4650_v61, %v5618_v42  ;;  %v4321_v61 = vpack.c.bf16 %v4538_v28, %v4537_v38 }
 0x598   :  { %3975 = vmatprep.mubr.msk.f32.mxu1 %vm199_vm1, %v1782_v20 }
 0x599   :  { %3976 = vmatmul.mubr.msk.f32.vlgmr.msra.gmra.mrb[32].mxu1 %vm199_vm1, %v1783_v35 }
 0x59a   :  { %v1691_v60 = vpop.xlane.xlu1 %1690  ;;  %4304 = vmatpush3.bf16.msra.mxu1 %v4301_v41 }
 0x59b   :  { %4306 = vmatprep.subr.bf16.mxu1 %v4305_v14  ;;  %v1688_v8 = vpop.xlane.xlu0 %1687 }
 0x59c   :  { %4651 = vrcp.f32 %v1688_v8 }
 0x59e   :  { %v1673_v49 = vpop.xlane.xlu1 %1672  ;;  %4308 = vmatpush3.bf16.msra.mxu1 %v4305_v14  ;;  %v4532_v14 = vunpack.i.l.bf16 %v5542_v51 }
 0x59f   :  { %4653 = vrcp.f32 %v1673_v49  ;;  %4318 = vmatprep.subr.bf16.mxu1 %v4317_v13  ;;  %v1670_v32 = vpop.xlane.xlu0 %1669 }
 0x5a0   :  { %4655 = vrcp.f32 %v1670_v32  ;;  %v4543_v32 = vunpack.i.h.bf16 %v5773_v29 }
 0x5a1   :  { %4657 = vrcp.f32 %v1691_v60 }
 0x5a2   :  { %v1697_v42 = vpop.xlane.xlu1 %1696 }
 0x5a3   :  { %4659 = vrcp.f32 %v1697_v42  ;;  %v4542_v42 = vunpack.i.l.bf16 %v5773_v29 }
 0x5a6   :  { %v1694_v18 = vpop.xlane.xlu1 %1693  ;;  %v4652_v10 = vpop.eup %4651 }
 0x5a7   :  { %4661 = vrcp.f32 %v1694_v18  ;;  %v1790_v37 = vmul.f32 %v4652_v10, %v5633_v3  ;;  %v4547_v3 = vunpack.i.l.bf16 %v5771_v55  ;;  %v4313_v10 = vpack.c.bf16 %v4533_v52, %v4532_v14 }
 0x5a9   :  { %v4654_v23 = vpop.eup %4653  ;;  %v4333_v20 = vpack.c.bf16 %v4548_v5, %v4547_v3 }
 0x5aa   :  { %v4656_v54 = vpop.eup %4655  ;;  %v1679_v50 = vpop.xlane.xlu1 %1678  ;;  %v1785_v31 = vmul.f32 %v4654_v23, %v5641_v63 }
 0x5ab   :  { %v1715_v56 = vpop.xlane.xlu0 %1714  ;;  %v1784_v41 = vmul.f32 %v4656_v54, %v5644_v53  ;;  %v4658_v24 = vpop.eup %4657  ;;  %4663 = vrcp.f32 %v1679_v50  ;;  %v4325_v50 = vpack.c.bf16 %v4543_v32, %v4542_v42 }
 0x5ac   :  { %v1791_v53 = vmul.f32 %v4658_v24, %v5631_v25 }
 0x5ad   :  { %3978 = vmatprep.mubr.msk.f32.mxu1 %vm199_vm1, %v1784_v41  ;;  %v4660_v21 = vpop.eup %4659 }
 0x5ae   :  { %3979 = vmatmul.mubr.msk.f32.gmra.mrb[34].mxu1 %vm199_vm1, %v1785_v31  ;;  %v1793_v25 = vmul.f32 %v4660_v21, %v5651_v16 }
 0x5af   :  { %v1685_v12 = vpop.xlane.xlu1 %1684  ;;  %v1676_v26 = vpop.xlane.xlu0 %1675  ;;  %4003 = vmatprep.mubr.msk.f32.mxu1 %vm199_vm1, %v1790_v37 }
 0x5b0   :  { %4665 = vrcp.f32 %v1676_v26 }
 0x5b1   :  { %v4662_v63 = vpop.eup %4661  ;;  %4667 = vrcp.f32 %v1715_v56 }
 0x5b2   :  { %4004 = vmatmul.mubr.msk.f32.vlgmr.msra.gmra.mrb[36].mxu1 %vm199_vm1, %v1791_v53  ;;  %v1792_v57 = vmul.f32 %v4662_v63, %v5656_v43 }
 0x5b3   :  { %v1721_v22 = vpop.xlane.xlu1 %1720  ;;  %4320 = vmatpush3.bf16.msra.mxu1 %v4317_v13  ;;  %v1712_v30 = vpop.xlane.xlu0 %1711 }
 0x5b4   :  { %4322 = vmatprep.subr.bf16.mxu1 %v4321_v61  ;;  %4006 = vmatprep.mubr.msk.f32.mxu1 %vm199_vm1, %v1792_v57  ;;  %4669 = vrcp.f32 %v1712_v30 }
 0x5b5   :  { %4671 = vrcp.f32 %v1685_v12  ;;  %v4664_v43 = vpop.eup %4663 }
 0x5b6   :  { %4007 = vmatmul.mubr.msk.f32.gmra.mrb[38].mxu1 %vm199_vm1, %v1793_v25  ;;  %v1787_v8 = vmul.f32 %v4664_v43, %v5662_v17 }
 0x5b7   :  { %v1682_v55 = vpop.xlane.xlu1 %1681  ;;  %4324 = vmatpush3.bf16.msra.mxu1 %v4321_v61 }
 0x5b8   :  { %4673 = vrcp.f32 %v1682_v55  ;;  %4334 = vmatprep.subr.bf16.mxu1 %v4333_v20  ;;  %v1700_v35 = vpop.xlane.xlu0 %1699 }
 0x5b9   :  { %4675 = vrcp.f32 %v1700_v35 }
 0x5ba   :  { %v4666_v15 = vpop.eup %4665  ;;  %4677 = vrcp.f32 %v1721_v22 }
 0x5bb   :  { %v1718_v60 = vpop.xlane.xlu1 %1717  ;;  %v1786_v16 = vmul.f32 %v4666_v15, %v5672_v11  ;;  %v4668_v13 = vpop.eup %4667 }
 0x5bc   :  { %4679 = vrcp.f32 %v1718_v60  ;;  %v1799_v17 = vmul.f32 %v4668_v13, %v5665_v58 }
 0x5bd   :  { %3989 = vmatprep.mubr.msk.f32.mxu0 %vm199_vm1, %v1786_v16 }
 0x5be   :  { %v4670_v49 = vpop.eup %4669  ;;  %3990 = vmatmul.mubr.msk.f32.vlgmr.msra.gmra.mrb[20].mxu0 %vm199_vm1, %v1787_v8 }
 0x5bf   :  { %v1703_v18 = vpop.xlane.xlu1 %1702  ;;  %4312 = vmatpush3.bf16.msra.mxu0 %v5354_v6  ;;  %v1798_v51 = vmul.f32 %v4670_v49, %v5677_v62  ;;  %v4672_v11 = vpop.eup %4671 }
 0x5c0   :  { %4681 = vrcp.f32 %v1703_v18  ;;  %4314 = vmatprep.subr.bf16.mxu0 %v4313_v10  ;;  %v1789_v6 = vmul.f32 %v4672_v11, %v5674_v48 }
 0x5c1   :  { %4031 = vmatprep.mubr.msk.f32.mxu1 %vm199_vm1, %v1798_v51 }
 0x5c2   :  { %v4674_v23 = vpop.eup %4673  ;;  %4032 = vmatmul.mubr.msk.f32.vlgmr.msra.gmra.mrb[40].mxu1 %vm199_vm1, %v1799_v17 }
 0x5c3   :  { %v4676_v54 = vpop.eup %4675  ;;  %v1739_v29 = vpop.xlane.xlu1 %1738  ;;  %v1788_v56 = vmul.f32 %v4674_v23, %v5690_v4  ;;  %4316 = vmatpush3.bf16.msra.mxu0 %v4313_v10  ;;  %4336 = vmatpush3.bf16.msra.mxu1 %v4333_v20  ;;  %v2806_v23 = vld [vmem:[%s6144_s3 + $0x10] sm:$0xff] }
 0x5c4   :  { %v1794_v62 = vmul.f32 %v4676_v54, %v5695_v46  ;;  %v4678_v41 = vpop.eup %4677  ;;  %4326 = vmatprep.subr.bf16.mxu0 %v4325_v50  ;;  %v2807_v54 = vld [vmem:[%s6144_s3 + $0x18] sm:$0xff] }
 0x5c5   :  { %3992 = vmatprep.mubr.msk.f32.mxu0 %vm199_vm1, %v1788_v56  ;;  %v1801_v4 = vmul.f32 %v4678_v41, %v5683_v2  ;;  %v1745_v2 = vpop.xlane.xlu0 %1744 }
 0x5c6   :  { %v4680_v58 = vpop.eup %4679  ;;  %3993 = vmatmul.mubr.msk.f32.gmra.mrb[22].mxu0 %vm199_vm1, %v1789_v6 }
 0x5c7   :  { %v1736_v31 = vpop.xlane.xlu1 %1735  ;;  %4017 = vmatprep.mubr.msk.f32.mxu0 %vm199_vm1, %v1794_v62  ;;  %v1800_v24 = vmul.f32 %v4680_v58, %v5699_v0 }
 0x5c8   :  { %4683 = vrcp.f32 %v1736_v31 }
 0x5c9   :  { %4034 = vmatprep.mubr.msk.f32.mxu1 %vm199_vm1, %v1800_v24 }
 0x5ca   :  { %v4682_v48 = vpop.eup %4681  ;;  %4035 = vmatmul.mubr.msk.f32.gmra.mrb[42].mxu1 %vm199_vm1, %v1801_v4 }
 0x5cb   :  { %v1795_v46 = vmul.f32 %v4682_v48, %v5706_v39  ;;  %v1709_v37 = vpop.xlane.xlu1 %1708  ;;  %v1742_v39 = vpop.xlane.xlu0 %1741 }
 0x5cc   :  { %4685 = vrcp.f32 %v1709_v37 }
 0x5cd   :  { %4018 = vmatmul.mubr.msk.f32.vlgmr.msra.gmra.mrb[24].mxu0 %vm199_vm1, %v1795_v46 }
 0x5ce   :  { %4328 = vmatpush3.bf16.msra.mxu0 %v4325_v50 }
 0x5cf   :  { %v1706_v28 = vpop.xlane.xlu1 %1705 }
 0x5d0   :  { %4687 = vrcp.f32 %v1706_v28 }
 0x5d2   :  { %v4684_v38 = vpop.eup %4683 }
 0x5d3   :  { %v1806_v0 = vmul.f32 %v4684_v38, %v5716_v7 }
 0x5d5   :  { %4059 = vmatprep.mubr.msk.f32.mxu1 %vm199_vm1, %v1806_v0 }
 0x5d6   :  { %v4686_v12 = vpop.eup %4685 }
 0x5d7   :  { %v1797_v53 = vmul.f32 %v4686_v12, %v5724_v19 }
 0x5da   :  { %v4688_v26 = vpop.eup %4687 }
 0x5db   :  { %v1796_v21 = vmul.f32 %v4688_v26, %v5730_v36 }
 0x5dd   :  { %4020 = vmatprep.mubr.msk.f32.mxu0 %vm199_vm1, %v1796_v21 }
 0x5de   :  { %4021 = vmatmul.mubr.msk.f32.gmra.mrb[26].mxu0 %vm199_vm1, %v1797_v53 }
 0x5df   :  { %v1727_v63 = vpop.xlane.xlu0 %1726 }
 0x5e3   :  { %v1724_v5 = vpop.xlane.xlu1 %1723 }
 0x5e4   :  { %4689 = vrcp.f32 %v1724_v5 }
 0x5e5   :  { %4691 = vrcp.f32 %v1727_v63 }
 0x5e6   :  { %4693 = vrcp.f32 %v1739_v29  ;;  %v4345_v29 = vpack.c.bf16 %v2807_v54, %v2806_v23 }
 0x5e7   :  { %4695 = vrcp.f32 %v1742_v39  ;;  %v1733_v7 = vpop.xlane.xlu1 %1732  ;;  %v1730_v3 = vpop.xlane.xlu0 %1729 }
 0x5e8   :  { %4697 = vrcp.f32 %v1733_v7 }
 0x5e9   :  { %4699 = vrcp.f32 %v1730_v3 }
 0x5ea   :  { %4701 = vrcp.f32 %v1745_v2 }
 0x5eb   :  { %v4556_v61 = vpop.permute.xlu1 %4555  ;;  %v4551_v36 = vpop.permute.xlu0 %4550 }
 0x5ec   :  { %v4558_v57 = vunpack.i.h.bf16 %v4556_v61  ;;  %v4557_v19 = vunpack.i.l.bf16 %v4556_v61  ;;  %v4553_v22 = vunpack.i.h.bf16 %v4551_v36  ;;  %v4552_v30 = vunpack.i.l.bf16 %v4551_v36 }
 0x5ee   :  { %v4690_v25 = vpop.eup %4689  ;;  %v4337_v20 = vpack.c.bf16 %v4558_v57, %v4557_v19  ;;  %v4329_v55 = vpack.c.bf16 %v4553_v22, %v4552_v30 }
 0x5ef   :  { %v4692_v35 = vpop.eup %4691  ;;  %v1802_v43 = vmul.f32 %v4690_v25, %v5755_v44 }
 0x5f0   :  { %v4694_v15 = vpop.eup %4693  ;;  %4330 = vmatprep.subr.bf16.mxu0 %v4329_v55  ;;  %4338 = vmatprep.subr.bf16.mxu1 %v4337_v20  ;;  %v1803_v60 = vmul.f32 %v4692_v35, %v5750_v1 }
 0x5f1   :  { %v4696_v52 = vpop.eup %4695  ;;  %4332 = vmatpush3.bf16.msra.mxu0 %v4329_v55  ;;  %4045 = vmatprep.mubr.msk.f32.mxu0 %vm199_vm1, %v1802_v43  ;;  %v1807_v8 = vmul.f32 %v4694_v15, %v5710_v9 }
 0x5f2   :  { %v4698_v14 = vpop.eup %4697  ;;  %4340 = vmatpush3.bf16.msra.mxu1 %v4337_v20  ;;  %v1808_v44 = vmul.f32 %v4696_v52, %v5720_v47 }
 0x5f3   :  { %v4700_v16 = vpop.eup %4699  ;;  %v1805_v32 = vmul.f32 %v4698_v14, %v5759_v45  ;;  %v2805_v45 = vld [vmem:[%s6144_s3 + $0x8] sm:$0xff] }
 0x5f4   :  { %v4702_v13 = vpop.eup %4701  ;;  %4046 = vmatmul.mubr.msk.f32.vlgmr.msra.gmra.mrb[28].mxu0 %vm199_vm1, %v1803_v60  ;;  %v1804_v49 = vmul.f32 %v4700_v16, %v5761_v40 }
 0x5f5   :  { %4060 = vmatmul.mubr.msk.f32.vlgmr.msra.gmra.mrb[44].mxu1 %vm199_vm1, %v1807_v8  ;;  %v1809_v1 = vmul.f32 %v4702_v13, %v5712_v59  ;;  %v2804_v59 = vld [vmem:[%s6144_s3] sm:$0xff] }
 0x5f6   :  { %4048 = vmatprep.mubr.msk.f32.mxu0 %vm199_vm1, %v1804_v49  ;;  %4062 = vmatprep.mubr.msk.f32.mxu1 %vm199_vm1, %v1808_v44  ;;  %v4341_v51 = vpack.c.bf16 %v2805_v45, %v2804_v59 }
 0x5f8   :  { %4049 = vmatmul.mubr.msk.f32.gmra.mrb[30].mxu0 %vm199_vm1, %v1805_v32  ;;  %4342 = vmatprep.subr.bf16.mxu0 %v4341_v51 }
 0x5f9   :  { %4063 = vmatmul.mubr.msk.f32.gmra.mrb[46].mxu1 %vm199_vm1, %v1809_v1  ;;  %4344 = vmatpush3.bf16.msra.mxu0 %v4341_v51 }
 0x5fa   :  { %4346 = vmatprep.subr.bf16.mxu0 %v4345_v29 }
 0x5fd   :  { %4348 = vmatpush3.bf16.msra.mxu0 %v4345_v29 }
 0x61b   :  { %v5844_v9 = vpop.f32.mrb[28].mxu1 }
 0x61c   :  { %v5846_v42 = vpop.f32.mrb[29].mxu1 }
 0x623   :  { %v5848_v40 = vpop.f32.mrb[30].mxu1 }
 0x624   :  { %v5850_v47 = vpop.f32.mrb[31].mxu1 }
 0x66c   :  { %v3977_v18 = vpop.f32.mrb[32].mxu1 }
 0x66d   :  { %2692 = vrot.lane.b32.xlu1 %v3977_v18, %s4762_s16  ;;  %v2009_v10 = vpop.f32.mrb[33].mxu1 }
 0x66e   :  { %2690 = vrot.lane.b32.xlu0 %v2009_v10, %s4762_s16 }
 0x681   :  { %v3980_v11 = vpop.f32.mrb[34].mxu1 }
 0x682   :  { %2696 = vrot.lane.b32.xlu1 %v3980_v11, %s4762_s16  ;;  %v2019_v17 = vpop.f32.mrb[35].mxu1 }
 0x683   :  { %2694 = vrot.lane.b32.xlu0 %v2019_v17, %s4762_s16 }
 0x685   :  { %v4005_v50 = vpop.f32.mrb[36].mxu1 }
 0x686   :  { %2756 = vrot.lane.b32.xlu1 %v4005_v50, %s4768_s17  ;;  %v2227_v56 = vpop.f32.mrb[37].mxu1 }
 0x687   :  { %2754 = vrot.lane.b32.xlu0 %v2227_v56, %s4768_s17 }
 0x689   :  { %v4008_v6 = vpop.f32.mrb[38].mxu1 }
 0x68a   :  { %2760 = vrot.lane.b32.xlu1 %v4008_v6, %s4768_s17  ;;  %v2237_v62 = vpop.f32.mrb[39].mxu1 }
 0x68b   :  { %2758 = vrot.lane.b32.xlu0 %v2237_v62, %s4768_s17 }
 0x691   :  { %v3991_v41 = vpop.f32.mrb[20].mxu0 }
 0x692   :  { %2724 = vrot.lane.b32.xlu1 %v3991_v41, %s4769_s18  ;;  %v2118_v58 = vpop.f32.mrb[21].mxu0 }
 0x693   :  { %2722 = vrot.lane.b32.xlu0 %v2118_v58, %s4769_s18 }
 0x695   :  { %v4033_v31 = vpop.f32.mrb[40].mxu1 }
 0x696   :  { %2700 = vrot.lane.b32.xlu1 %v4033_v31, %s4762_s16  ;;  %v2445_v24 = vpop.f32.mrb[41].mxu1 }
 0x697   :  { %2698 = vrot.lane.b32.xlu0 %v2445_v24, %s4762_s16 }
 0x699   :  { %v3994_v4 = vpop.f32.mrb[22].mxu0 }
 0x69a   :  { %v2128_v48 = vpop.f32.mrb[23].mxu0  ;;  %2728 = vrot.lane.b32.xlu1 %v3994_v4, %s4769_s18 }
 0x69b   :  { %2726 = vrot.lane.b32.xlu0 %v2128_v48, %s4769_s18 }
 0x69d   :  { %v4036_v46 = vpop.f32.mrb[42].mxu1 }
 0x69e   :  { %v2455_v37 = vpop.f32.mrb[43].mxu1  ;;  %2704 = vrot.lane.b32.xlu1 %v4036_v46, %s4762_s16 }
 0x69f   :  { %2702 = vrot.lane.b32.xlu0 %v2455_v37, %s4762_s16  ;;  %v2810_v37 = vsub.s32 4, %v4896_v27 }
 0x6a0   :  { %v4019_v28 = vpop.f32.mrb[24].mxu0 }
 0x6a1   :  { %v2336_v38 = vpop.f32.mrb[25].mxu0 }
 0x6b1   :  { %v4022_v0 = vpop.f32.mrb[26].mxu0 }
 0x6b2   :  { %v5880_v2 = vpop.f32.mrb[27].mxu0 }
 0x6c7   :  { %v4047_v12 = vpop.f32.mrb[28].mxu0 }
 0x6c8   :  { %v4061_v26 = vpop.f32.mrb[44].mxu1  ;;  %v2554_v21 = vpop.f32.mrb[29].mxu0 }
 0x6c9   :  { %2764 = vrot.lane.b32.xlu1 %v4061_v26, %s4768_s17  ;;  %v2663_v53 = vpop.f32.mrb[45].mxu1 }
 0x6ca   :  { %2762 = vrot.lane.b32.xlu0 %v2663_v53, %s4768_s17 }
 0x6cb   :  { %v4050_v39 = vpop.f32.mrb[30].mxu0 }
 0x6cc   :  { %v4064_v63 = vpop.f32.mrb[46].mxu1  ;;  %v2564_v5 = vpop.f32.mrb[31].mxu0 }
 0x6cd   :  { %v2673_v7 = vpop.f32.mrb[47].mxu1  ;;  %2732 = vrot.lane.b32.xlu1 %v4047_v12, %s4769_s18 }
 0x6ce   :  { %2730 = vrot.lane.b32.xlu0 %v2554_v21, %s4769_s18 }
 0x6d1   :  { %2736 = vrot.lane.b32.xlu1 %v4050_v39, %s4769_s18 }
 0x6d2   :  { %2734 = vrot.lane.b32.xlu0 %v2564_v5, %s4769_s18 }
 0x6d5   :  { %2768 = vrot.lane.b32.xlu1 %v4064_v63, %s4768_s17 }
 0x6d6   :  { %2766 = vrot.lane.b32.xlu0 %v2673_v7, %s4768_s17 }
 0x6df   :  { %v2693_v3 = vpop.permute.xlu1 %2692 }
 0x6e0   :  { %v2691_v61 = vpop.permute.xlu0 %2690  ;;  %v2779_v20 = vsel %vm545_vm2, %v5844_v9, %v2693_v3 }
 0x6e1   :  { %v2778_v35 = vsel %vm545_vm2, %v5846_v42, %v2691_v61 }
 0x6f4   :  { %v2697_v36 = vpop.permute.xlu1 %2696 }
 0x6f5   :  { %v2695_v57 = vpop.permute.xlu0 %2694  ;;  %v2781_v13 = vsel %vm545_vm2, %v5848_v40, %v2697_v36 }
 0x6f6   :  { %v2780_v44 = vsel %vm545_vm2, %v5850_v47, %v2695_v57  ;;  %v6164_v57 = vld [vmem:[#allocation6_spill] sm:$0xff] }
 0x6f8   :  { %v2757_v19 = vpop.permute.xlu1 %2756 }
 0x6f9   :  { %v2755_v22 = vpop.permute.xlu0 %2754 }
 0x6fc   :  { %v2761_v30 = vpop.permute.xlu1 %2760 }
 0x6fd   :  { %v2759_v25 = vpop.permute.xlu0 %2758 }
 0x704   :  { %v2725_v55 = vpop.permute.xlu1 %2724 }
 0x705   :  { %v2788_v43 = vsel %vm2786_vm4, %v2779_v20, %v2725_v55  ;;  %v2723_v15 = vpop.permute.xlu0 %2722 }
 0x706   :  { %v2787_v52 = vsel %vm2786_vm4, %v2778_v35, %v2723_v15  ;;  %v2797_v60 = vsel %vm2795_vm5, %v2788_v43, %v2757_v19 }
 0x707   :  { %v2796_v14 = vsel %vm2795_vm5, %v2787_v52, %v2755_v22 }
 0x708   :  { %v2701_v16 = vpop.permute.xlu1 %2700  ;;  %4073 = vmatprep.mubr.msk.f32.mxu0 %vm199_vm1, %v2796_v14  ;;  %v3093_v14 = vld [vmem:[#allocation2] sm:$0xff] }
 0x709   :  { %v2699_v8 = vpop.permute.xlu0 %2698  ;;  %4074 = vmatmul.mubr.msk.f32.vlgmr.msra.gmra.mrb[32].mxu0 %vm199_vm1, %v2797_v60  ;;  %v2783_v51 = vsel %vm545_vm2, %v4019_v28, %v2701_v16  ;;  %v5931_v28 = vld [vmem:[%s6148_s7] sm:$0xff]  ;;  %v3094_v60 = vld [vmem:[#allocation2 + $0x8] sm:$0xff] }
 0x70a   :  { %v2782_v11 = vsel %vm545_vm2, %v2336_v38, %v2699_v8  ;;  %v2811_v38 = vrot.slane %v5931_v28, %v2810_v37  ;;  %v4349_v16 = vpack.c.bf16 %v3094_v60, %v3093_v14  ;;  %v3095_v8 = vld [vmem:[#allocation2 + $0x10] sm:$0xff] }
 0x70c   :  { %v2729_v49 = vpop.permute.xlu1 %2728  ;;  %4350 = vmatprep.subr.bf16.mxu1 %v4349_v16 }
 0x70d   :  { %v2790_v32 = vsel %vm2786_vm4, %v2781_v13, %v2729_v49  ;;  %v2727_v1 = vpop.permute.xlu0 %2726  ;;  %v3096_v13 = vld [vmem:[#allocation2 + $0x18] sm:$0xff]  ;;  %4352 = vmatpush3.bf16.msra.mxu1 %v4349_v16  ;;  %v3071_v16 = vsub.s32 5, %v4896_v27 }
 0x70e   :  { %v2789_v9 = vsel %vm2786_vm4, %v2780_v44, %v2727_v1  ;;  %v2799_v18 = vsel %vm2795_vm5, %v2790_v32, %v2761_v30  ;;  %v4353_v49 = vpack.c.bf16 %v3096_v13, %v3095_v8 }
 0x70f   :  { %v2798_v42 = vsel %vm2795_vm5, %v2789_v9, %v2759_v25  ;;  %v6165_v25 = vld [vmem:[#allocation5_spill] sm:$0xff] }
 0x710   :  { %4076 = vmatprep.mubr.msk.f32.mxu0 %vm199_vm1, %v2798_v42  ;;  %v2705_v10 = vpop.permute.xlu1 %2704  ;;  %4354 = vmatprep.subr.bf16.mxu1 %v4353_v49  ;;  %v6166_v42 = vld [vmem:[#allocation8_spill] sm:$0xff] }
 0x711   :  { %4077 = vmatmul.mubr.msk.f32.gmra.mrb[34].mxu0 %vm199_vm1, %v2799_v18  ;;  %v2703_v59 = vpop.permute.xlu0 %2702  ;;  %v2785_v29 = vsel %vm545_vm2, %v4022_v0, %v2705_v10  ;;  %4356 = vmatpush3.bf16.msra.mxu1 %v4353_v49  ;;  %v6167_v10 = vld [vmem:[#allocation7_spill] sm:$0xff] }
 0x712   :  { %v2784_v62 = vsel %vm545_vm2, %v5880_v2, %v2703_v59 }
 0x73b   :  { %v2765_v40 = vpop.permute.xlu1 %2764 }
 0x73c   :  { %v2763_v45 = vpop.permute.xlu0 %2762 }
 0x73f   :  { %v2733_v47 = vpop.permute.xlu1 %2732 }
 0x740   :  { %v2792_v17 = vsel %vm2786_vm4, %v2783_v51, %v2733_v47  ;;  %v2731_v23 = vpop.permute.xlu0 %2730 }
 0x741   :  { %v2791_v54 = vsel %vm2786_vm4, %v2782_v11, %v2731_v23  ;;  %v2801_v6 = vsel %vm2795_vm5, %v2792_v17, %v2765_v40 }
 0x742   :  { %v2800_v50 = vsel %vm2795_vm5, %v2791_v54, %v2763_v45 }
 0x743   :  { %4079 = vmatprep.mubr.msk.f32.mxu0 %vm199_vm1, %v2800_v50  ;;  %v2737_v56 = vpop.permute.xlu1 %2736 }
 0x744   :  { %v2794_v41 = vsel %vm2786_vm4, %v2785_v29, %v2737_v56  ;;  %4080 = vmatmul.mubr.msk.f32.gmra.mrb[36].mxu0 %vm199_vm1, %v2801_v6  ;;  %v2735_v58 = vpop.permute.xlu0 %2734  ;;  %v6168_v29 = vld [vmem:[#allocation10_spill] sm:$0xff] }
 0x745   :  { %v2793_v31 = vsel %vm2786_vm4, %v2784_v62, %v2735_v58  ;;  %v6169_v62 = vld [vmem:[#allocation9_spill] sm:$0xff] }
 0x747   :  { %v2769_v24 = vpop.permute.xlu1 %2768 }
 0x748   :  { %v2767_v4 = vpop.permute.xlu0 %2766  ;;  %v2803_v46 = vsel %vm2795_vm5, %v2794_v41, %v2769_v24 }
 0x749   :  { %v2802_v48 = vsel %vm2795_vm5, %v2793_v31, %v2767_v4 }
 0x74a   :  { %4082 = vmatprep.mubr.msk.f32.mxu0 %vm199_vm1, %v2802_v48 }
 0x74b   :  { %4083 = vmatmul.mubr.msk.f32.gmra.mrb[38].mxu0 %vm199_vm1, %v2803_v46 }
 0x7dc   :  { %v4075_v0 = vpop.f32.mrb[32].mxu0 }
 0x7dd   :  { %v2908_v2 = vadd.f32 %v4075_v0, %v2811_v38  ;;  %v2902_v12 = vpop.f32.mrb[33].mxu0 }
 0x7de   :  { %v2903_v26 = vadd.f32 %v2902_v12, %v2811_v38 }
 0x7df   :  { %v5935_v21 = vadd.f32 %v2908_v2, %v4905_v33 }
 0x7e0   :  { %v5938_v53 = vadd.f32 %v2903_v26, %v4907_v34 }
 0x7e1   :  { %v2952_v39 = vsel %vm199_vm1, %v5935_v21, 0.0  ;;  %v2974_v5 = vmul.f32 %v5935_v21, %v5935_v21 }
 0x7e2   :  { %2953 = vadd.xlane.f32.xlu1 %v2952_v39  ;;  %v2949_v63 = vsel %vm199_vm1, %v5938_v53, 0.0  ;;  %v2973_v34 = vmul.f32 %v5938_v53, %v5938_v53 }
 0x7e3   :  { %2950 = vadd.xlane.f32.xlu0 %v2949_v63  ;;  %v2984_v33 = vsel %vm199_vm1, %v2974_v5, 0.0 }
 0x7e4   :  { %v4078_v7 = vpop.f32.mrb[34].mxu0  ;;  %v2981_v55 = vsel %vm199_vm1, %v2973_v34, 0.0 }
 0x7e5   :  { %v2918_v3 = vadd.f32 %v4078_v7, %v2811_v38  ;;  %v2912_v61 = vpop.f32.mrb[35].mxu0 }
 0x7e6   :  { %v2913_v36 = vadd.f32 %v2912_v61, %v2811_v38 }
 0x7e7   :  { %v5950_v19 = vadd.f32 %v2918_v3, %v6164_v57  ;;  %2985 = vadd.xlane.f32.xlu0 %v2984_v33 }
 0x7e8   :  { %v5957_v20 = vadd.f32 %v2913_v36, %v6165_v25 }
 0x7e9   :  { %v2958_v22 = vsel %vm199_vm1, %v5950_v19, 0.0  ;;  %v2976_v30 = vmul.f32 %v5950_v19, %v5950_v19 }
 0x7ea   :  { %2959 = vadd.xlane.f32.xlu1 %v2958_v22  ;;  %v2955_v43 = vsel %vm199_vm1, %v5957_v20, 0.0  ;;  %v2975_v15 = vmul.f32 %v5957_v20, %v5957_v20 }
 0x7eb   :  { %2982 = vadd.xlane.f32.xlu0 %v2981_v55  ;;  %v2990_v35 = vsel %vm199_vm1, %v2976_v30, 0.0 }
 0x7ec   :  { %v2987_v52 = vsel %vm199_vm1, %v2975_v15, 0.0 }
 0x7ee   :  { %2991 = vadd.xlane.f32.xlu1 %v2990_v35 }
 0x7ef   :  { %2956 = vadd.xlane.f32.xlu0 %v2955_v43 }
 0x7f3   :  { %2988 = vadd.xlane.f32.xlu0 %v2987_v52 }
 0x817   :  { %v4081_v44 = vpop.f32.mrb[36].mxu0 }
 0x818   :  { %v2928_v32 = vadd.f32 %v4081_v44, %v2811_v38  ;;  %v2922_v1 = vpop.f32.mrb[37].mxu0 }
 0x819   :  { %v2923_v9 = vadd.f32 %v2922_v1, %v2811_v38 }
 0x81a   :  { %v5967_v18 = vadd.f32 %v2928_v32, %v6166_v42  ;;  %v6001_v32 = vrot.slane %v5931_v28, %v3071_v16 }
 0x81b   :  { %v5970_v59 = vadd.f32 %v2923_v9, %v6167_v10  ;;  %v3083_v9 = vsub.s32 6, %v4896_v27 }
 0x81c   :  { %v2964_v40 = vsel %vm199_vm1, %v5967_v18, 0.0  ;;  %v2978_v45 = vmul.f32 %v5967_v18, %v5967_v18 }
 0x81d   :  { %2965 = vadd.xlane.f32.xlu1 %v2964_v40  ;;  %v2961_v51 = vsel %vm199_vm1, %v5970_v59, 0.0  ;;  %v2977_v47 = vmul.f32 %v5970_v59, %v5970_v59 }
 0x81e   :  { %v4084_v11 = vpop.f32.mrb[38].mxu0  ;;  %2962 = vadd.xlane.f32.xlu0 %v2961_v51  ;;  %v2996_v50 = vsel %vm199_vm1, %v2978_v45, 0.0  ;;  %v6007_v51 = vrot.slane %v5931_v28, %v3083_v9 }
 0x81f   :  { %v2938_v17 = vadd.f32 %v4084_v11, %v2811_v38  ;;  %v2932_v23 = vpop.f32.mrb[39].mxu0  ;;  %v2993_v6 = vsel %vm199_vm1, %v2977_v47, 0.0 }
 0x820   :  { %v2933_v54 = vadd.f32 %v2932_v23, %v2811_v38 }
 0x821   :  { %v5982_v56 = vadd.f32 %v2938_v17, %v6168_v29  ;;  %2997 = vadd.xlane.f32.xlu1 %v2996_v50 }
 0x822   :  { %v5986_v41 = vadd.f32 %v2933_v54, %v6169_v62  ;;  %2994 = vadd.xlane.f32.xlu0 %v2993_v6 }
 0x823   :  { %v2970_v58 = vsel %vm199_vm1, %v5982_v56, 0.0  ;;  %v2980_v24 = vmul.f32 %v5982_v56, %v5982_v56 }
 0x824   :  { %v2967_v31 = vsel %vm199_vm1, %v5986_v41, 0.0  ;;  %v2979_v4 = vmul.f32 %v5986_v41, %v5986_v41 }
 0x825   :  { %2971 = vadd.xlane.f32.xlu1 %v2970_v58  ;;  %v3002_v48 = vsel %vm199_vm1, %v2980_v24, 0.0 }
 0x826   :  { %2968 = vadd.xlane.f32.xlu0 %v2967_v31  ;;  %v2999_v46 = vsel %vm199_vm1, %v2979_v4, 0.0 }
 0x829   :  { %3003 = vadd.xlane.f32.xlu1 %v3002_v48 }
 0x82a   :  { %3000 = vadd.xlane.f32.xlu0 %v2999_v46 }
 0x86f   :  { %v2954_v37 = vpop.xlane.xlu1 %2953 }
 0x870   :  { %v2951_v38 = vpop.xlane.xlu0 %2950  ;;  %v3006_v0 = vmul.f32 0.03125, %v2954_v37 }
 0x871   :  { %v3005_v26 = vmul.f32 0.03125, %v2951_v38 }
 0x872   :  { %v3022_v12 = vmul.f32 %v3006_v0, %v3006_v0  ;;  %v3038_v49 = vsub.f32 %v5935_v21, %v3006_v0 }
 0x873   :  { %v3021_v61 = vmul.f32 %v3005_v26, %v3005_v26  ;;  %v3037_v42 = vsub.f32 %v5938_v53, %v3005_v26 }
 0x874   :  { %v2986_v2 = vpop.xlane.xlu0 %2985 }
 0x875   :  { %v3014_v39 = vmul.f32 0.03125, %v2986_v2 }
 0x877   :  { %v3030_v63 = vsub.f32 %v3014_v39, %v3022_v12  ;;  %v2960_v5 = vpop.xlane.xlu1 %2959 }
 0x878   :  { %v3008_v7 = vmul.f32 0.03125, %v2960_v5  ;;  %v2983_v3 = vpop.xlane.xlu0 %2982 }
 0x879   :  { %v3046_v36 = vadd.f32 1e-05, %v3030_v63  ;;  %v3013_v33 = vmul.f32 0.03125, %v2983_v3 }
 0x87a   :  { %v3024_v22 = vmul.f32 %v3008_v7, %v3008_v7  ;;  %v3040_v17 = vsub.f32 %v5950_v19, %v3008_v7 }
 0x87b   :  { %4703 = vrsqrt.f32 %v3046_v36  ;;  %v3029_v34 = vsub.f32 %v3013_v33, %v3021_v61  ;;  %v2992_v57 = vpop.xlane.xlu1 %2991 }
 0x87c   :  { %v3016_v30 = vmul.f32 0.03125, %v2992_v57  ;;  %v2957_v25 = vpop.xlane.xlu0 %2956 }
 0x87d   :  { %v3045_v55 = vadd.f32 1e-05, %v3029_v34  ;;  %v3007_v35 = vmul.f32 0.03125, %v2957_v25 }
 0x87e   :  { %v3032_v43 = vsub.f32 %v3016_v30, %v3024_v22 }
 0x87f   :  { %4705 = vrsqrt.f32 %v3045_v55  ;;  %v3023_v14 = vmul.f32 %v3007_v35, %v3007_v35  ;;  %v3039_v29 = vsub.f32 %v5957_v20, %v3007_v35 }
 0x880   :  { %v3048_v15 = vadd.f32 1e-05, %v3032_v43  ;;  %v2989_v52 = vpop.xlane.xlu0 %2988 }
 0x881   :  { %v3015_v60 = vmul.f32 0.03125, %v2989_v52 }
 0x882   :  { %4707 = vrsqrt.f32 %v3048_v15 }
 0x883   :  { %v3031_v8 = vsub.f32 %v3015_v60, %v3023_v14 }
 0x885   :  { %v4704_v13 = vpop.eup %4703  ;;  %v3047_v44 = vadd.f32 1e-05, %v3031_v8 }
 0x886   :  { %v3062_v1 = vmul.f32 %v4704_v13, %v3038_v49 }
 0x887   :  { %4709 = vrsqrt.f32 %v3047_v44 }
 0x888   :  { %v3074_v45 = vmul.f32 %v6001_v32, %v3062_v1 }
 0x889   :  { %v4706_v10 = vpop.eup %4705 }
 0x88a   :  { %v3061_v40 = vmul.f32 %v4706_v10, %v3037_v42  ;;  %v3086_v54 = vadd.f32 %v6007_v51, %v3074_v45 }
 0x88c   :  { %v4708_v47 = vpop.eup %4707  ;;  %v3073_v11 = vmul.f32 %v6001_v32, %v3061_v40 }
 0x88d   :  { %v3064_v50 = vmul.f32 %v4708_v47, %v3040_v17 }
 0x88e   :  { %v3085_v23 = vadd.f32 %v6007_v51, %v3073_v11 }
 0x88f   :  { %v3076_v58 = vmul.f32 %v6001_v32, %v3064_v50 }
 0x890   :  { %4093 = vmatprep.mubr.msk.f32.mxu1 %vm199_vm1, %v3085_v23 }
 0x891   :  { %v4710_v6 = vpop.eup %4709  ;;  %4094 = vmatmul.mubr.msk.f32.vlgmr.msra.gmra.mrb[48].mxu1 %vm199_vm1, %v3086_v54  ;;  %v3088_v4 = vadd.f32 %v6007_v51, %v3076_v58  ;;  %v3302_v58 = vld [vmem:[%s6147_s6] sm:$0xff] }
 0x892   :  { %v3063_v62 = vmul.f32 %v4710_v6, %v3039_v29 }
 0x894   :  { %v3075_v31 = vmul.f32 %v6001_v32, %v3063_v62 }
 0x896   :  { %v3087_v24 = vadd.f32 %v6007_v51, %v3075_v31  ;;  %v3303_v31 = vld [vmem:[%s6147_s6 + $0x8] sm:$0xff] }
 0x898   :  { %4096 = vmatprep.mubr.msk.f32.mxu1 %vm199_vm1, %v3087_v24  ;;  %v4357_v24 = vpack.c.bf16 %v3303_v31, %v3302_v58 }
 0x899   :  { %4097 = vmatmul.mubr.msk.f32.gmra.mrb[50].mxu1 %vm199_vm1, %v3088_v4 }
 0x89a   :  { %4358 = vmatprep.subr.bf16.mxu0 %v4357_v24 }
 0x89b   :  { %4360 = vmatpush3.bf16.msra.mxu0 %v4357_v24 }
 0x8aa   :  { %v2966_v48 = vpop.xlane.xlu1 %2965 }
 0x8ab   :  { %v3010_v46 = vmul.f32 0.03125, %v2966_v48  ;;  %v2963_v37 = vpop.xlane.xlu0 %2962  ;;  %v3306_v48 = vld [vmem:[%s6147_s6 + $0x20] sm:$0xff] }
 0x8ac   :  { %v3009_v38 = vmul.f32 0.03125, %v2963_v37 }
 0x8ad   :  { %v3026_v2 = vmul.f32 %v3010_v46, %v3010_v46  ;;  %v3042_v16 = vsub.f32 %v5967_v18, %v3010_v46  ;;  %v3307_v46 = vld [vmem:[%s6147_s6 + $0x28] sm:$0xff] }
 0x8ae   :  { %v2998_v0 = vpop.xlane.xlu1 %2997  ;;  %v3025_v39 = vmul.f32 %v3009_v38, %v3009_v38  ;;  %v3041_v13 = vsub.f32 %v5970_v59, %v3009_v38  ;;  %v4365_v37 = vpack.c.bf16 %v3307_v46, %v3306_v48  ;;  %v3308_v38 = vld [vmem:[%s6147_s6 + $0x30] sm:$0xff] }
 0x8af   :  { %v3018_v12 = vmul.f32 0.03125, %v2998_v0  ;;  %v2995_v26 = vpop.xlane.xlu0 %2994  ;;  %v3309_v0 = vld [vmem:[%s6147_s6 + $0x38] sm:$0xff] }
 0x8b0   :  { %v3017_v63 = vmul.f32 0.03125, %v2995_v26  ;;  %v3311_v26 = vld [vmem:[%s6147_s6 + $0x48] sm:$0xff] }
 0x8b1   :  { %v3034_v5 = vsub.f32 %v3018_v12, %v3026_v2  ;;  %v4369_v2 = vpack.c.bf16 %v3309_v0, %v3308_v38  ;;  %v3310_v12 = vld [vmem:[%s6147_s6 + $0x40] sm:$0xff] }
 0x8b2   :  { %v3033_v7 = vsub.f32 %v3017_v63, %v3025_v39  ;;  %v2972_v3 = vpop.xlane.xlu1 %2971  ;;  %v4373_v39 = vpack.c.bf16 %v3311_v26, %v3310_v12  ;;  %v3312_v63 = vld [vmem:[%s6147_s6 + $0x50] sm:$0xff] }
 0x8b3   :  { %v3050_v61 = vadd.f32 1e-05, %v3034_v5  ;;  %v3012_v36 = vmul.f32 0.03125, %v2972_v3  ;;  %v2969_v33 = vpop.xlane.xlu0 %2968  ;;  %v3313_v5 = vld [vmem:[%s6147_s6 + $0x58] sm:$0xff]  ;;  %v3314_v3 = vld [vmem:[%s6147_s6 + $0x60] sm:$0xff] }
 0x8b4   :  { %v3049_v34 = vadd.f32 1e-05, %v3033_v7  ;;  %v3011_v57 = vmul.f32 0.03125, %v2969_v33  ;;  %v4377_v7 = vpack.c.bf16 %v3313_v5, %v3312_v63  ;;  %v3316_v33 = vld [vmem:[%s6147_s6 + $0x70] sm:$0xff] }
 0x8b5   :  { %4711 = vrsqrt.f32 %v3050_v61  ;;  %v3028_v30 = vmul.f32 %v3012_v36, %v3012_v36  ;;  %v3044_v40 = vsub.f32 %v5982_v56, %v3012_v36  ;;  %v3315_v61 = vld [vmem:[%s6147_s6 + $0x68] sm:$0xff] }
 0x8b6   :  { %4713 = vrsqrt.f32 %v3049_v34  ;;  %v3004_v22 = vpop.xlane.xlu1 %3003  ;;  %v3027_v35 = vmul.f32 %v3011_v57, %v3011_v57  ;;  %v3043_v11 = vsub.f32 %v5986_v41, %v3011_v57  ;;  %v4381_v36 = vpack.c.bf16 %v3315_v61, %v3314_v3  ;;  %v3317_v34 = vld [vmem:[%s6147_s6 + $0x78] sm:$0xff] }
 0x8b7   :  { %v3020_v25 = vmul.f32 0.03125, %v3004_v22  ;;  %v3001_v55 = vpop.xlane.xlu0 %3000  ;;  %v4385_v57 = vpack.c.bf16 %v3317_v34, %v3316_v33  ;;  %v3099_v22 = vsub.s32 7, %v4896_v27 }
 0x8b8   :  { %v3019_v43 = vmul.f32 0.03125, %v3001_v55 }
 0x8b9   :  { %v3036_v15 = vsub.f32 %v3020_v25, %v3028_v30  ;;  %v6088_v30 = vrot.slane %v5931_v28, %v3099_v22 }
 0x8ba   :  { %v3035_v52 = vsub.f32 %v3019_v43, %v3027_v35 }
 0x8bb   :  { %v3052_v14 = vadd.f32 1e-05, %v3036_v15 }
 0x8bc   :  { %v3051_v60 = vadd.f32 1e-05, %v3035_v52 }
 0x8bd   :  { %4715 = vrsqrt.f32 %v3052_v14 }
 0x8be   :  { %4717 = vrsqrt.f32 %v3051_v60 }
 0x8bf   :  { %v4712_v8 = vpop.eup %4711 }
 0x8c0   :  { %v4714_v49 = vpop.eup %4713  ;;  %v3066_v44 = vmul.f32 %v4712_v8, %v3042_v16 }
 0x8c1   :  { %v3065_v1 = vmul.f32 %v4714_v49, %v3041_v13 }
 0x8c2   :  { %v3078_v9 = vmul.f32 %v6001_v32, %v3066_v44 }
 0x8c3   :  { %v3077_v42 = vmul.f32 %v6001_v32, %v3065_v1 }
 0x8c4   :  { %v3090_v45 = vadd.f32 %v6007_v51, %v3078_v9 }
 0x8c5   :  { %v3089_v10 = vadd.f32 %v6007_v51, %v3077_v42 }
 0x8c7   :  { %v4716_v47 = vpop.eup %4715  ;;  %4099 = vmatprep.mubr.msk.f32.mxu1 %vm199_vm1, %v3089_v10 }
 0x8c8   :  { %v4718_v17 = vpop.eup %4717  ;;  %4100 = vmatmul.mubr.msk.f32.gmra.mrb[52].mxu1 %vm199_vm1, %v3090_v45  ;;  %v3068_v23 = vmul.f32 %v4716_v47, %v3044_v40 }
 0x8c9   :  { %v3067_v54 = vmul.f32 %v4718_v17, %v3043_v11 }
 0x8ca   :  { %v3080_v50 = vmul.f32 %v6001_v32, %v3068_v23 }
 0x8cb   :  { %v3079_v29 = vmul.f32 %v6001_v32, %v3067_v54  ;;  %v3304_v32 = vld [vmem:[%s6147_s6 + $0x10] sm:$0xff] }
 0x8cc   :  { %v3092_v6 = vadd.f32 %v6007_v51, %v3080_v50 }
 0x8cd   :  { %v3091_v62 = vadd.f32 %v6007_v51, %v3079_v29  ;;  %v3305_v51 = vld [vmem:[%s6147_s6 + $0x18] sm:$0xff] }
 0x8ce   :  { %v4361_v4 = vpack.c.bf16 %v3305_v51, %v3304_v32 }
 0x8cf   :  { %4102 = vmatprep.mubr.msk.f32.mxu1 %vm199_vm1, %v3091_v62 }
 0x8d0   :  { %4103 = vmatmul.mubr.msk.f32.gmra.mrb[54].mxu1 %vm199_vm1, %v3092_v6  ;;  %4362 = vmatprep.subr.bf16.mxu0 %v4361_v4 }
 0x8d1   :  { %4364 = vmatpush3.bf16.msra.mxu0 %v4361_v4 }
 0x8d2   :  { %4366 = vmatprep.subr.bf16.mxu0 %v4365_v37 }
 0x8d5   :  { %4368 = vmatpush3.bf16.msra.mxu0 %v4365_v37 }
 0x8d6   :  { %4370 = vmatprep.subr.bf16.mxu0 %v4369_v2 }
 0x8d9   :  { %4372 = vmatpush3.bf16.msra.mxu0 %v4369_v2 }
 0x8da   :  { %4374 = vmatprep.subr.bf16.mxu0 %v4373_v39 }
 0x8dd   :  { %4376 = vmatpush3.bf16.msra.mxu0 %v4373_v39 }
 0x8de   :  { %4378 = vmatprep.subr.bf16.mxu0 %v4377_v7 }
 0x8e1   :  { %4380 = vmatpush3.bf16.msra.mxu0 %v4377_v7 }
 0x8e2   :  { %4382 = vmatprep.subr.bf16.mxu0 %v4381_v36 }
 0x8e5   :  { %4384 = vmatpush3.bf16.msra.mxu0 %v4381_v36 }
 0x8e6   :  { %4386 = vmatprep.subr.bf16.mxu0 %v4385_v57 }
 0x8e9   :  { %4388 = vmatpush3.bf16.msra.mxu0 %v4385_v57 }
 0x964   :  { %v4095_v25 = vpop.f32.mrb[48].mxu1 }
 0x965   :  { %v3197_v55 = vadd.f32 %v4095_v25, %v6088_v30  ;;  %v3191_v35 = vpop.f32.mrb[49].mxu1 }
 0x966   :  { %v3192_v43 = vadd.f32 %v3191_v35, %v6088_v30 }
 0x967   :  { %v3231_v15 = vmul.f32 %v3197_v55, %v3197_v55 }
 0x968   :  { %v3230_v52 = vmul.f32 %v3192_v43, %v3192_v43 }
 0x969   :  { %v3239_v14 = vmul.f32 %v3231_v15, %v3197_v55 }
 0x96a   :  { %v3238_v60 = vmul.f32 %v3230_v52, %v3192_v43 }
 0x96b   :  { %v3247_v16 = vmul.f32 0.044715, %v3239_v14 }
 0x96c   :  { %v3246_v8 = vmul.f32 0.044715, %v3238_v60  ;;  %v4098_v13 = vpop.f32.mrb[50].mxu1 }
 0x96d   :  { %v3255_v49 = vadd.f32 %v3247_v16, %v3197_v55  ;;  %v3207_v44 = vadd.f32 %v4098_v13, %v6088_v30  ;;  %v3201_v27 = vpop.f32.mrb[51].mxu1 }
 0x96e   :  { %v3254_v1 = vadd.f32 %v3246_v8, %v3192_v43  ;;  %v3202_v28 = vadd.f32 %v3201_v27, %v6088_v30 }
 0x96f   :  { %v3263_v9 = vmul.f32 0.7978846, %v3255_v49  ;;  %v3233_v42 = vmul.f32 %v3207_v44, %v3207_v44 }
 0x970   :  { %v3262_v10 = vmul.f32 0.7978846, %v3254_v1  ;;  %v3232_v40 = vmul.f32 %v3202_v28, %v3202_v28 }
 0x971   :  { %4719 = vtanh.f32 %v3263_v9  ;;  %v3241_v45 = vmul.f32 %v3233_v42, %v3207_v44 }
 0x972   :  { %v3240_v47 = vmul.f32 %v3232_v40, %v3202_v28  ;;  %4721 = vtanh.f32 %v3262_v10 }
 0x973   :  { %v3249_v11 = vmul.f32 0.044715, %v3241_v45 }
 0x974   :  { %v3248_v17 = vmul.f32 0.044715, %v3240_v47 }
 0x975   :  { %v3257_v23 = vadd.f32 %v3249_v11, %v3207_v44 }
 0x976   :  { %v3256_v54 = vadd.f32 %v3248_v17, %v3202_v28 }
 0x977   :  { %v3265_v50 = vmul.f32 0.7978846, %v3257_v23 }
 0x978   :  { %v3264_v29 = vmul.f32 0.7978846, %v3256_v54 }
 0x979   :  { %4723 = vtanh.f32 %v3265_v50 }
 0x97a   :  { %4725 = vtanh.f32 %v3264_v29 }
 0x97b   :  { %v4720_v6 = vpop.eup %4719 }
 0x97c   :  { %v4722_v62 = vpop.eup %4721  ;;  %v3279_v58 = vadd.f32 1.0, %v4720_v6 }
 0x97d   :  { %v3278_v31 = vadd.f32 1.0, %v4722_v62 }
 0x97e   :  { %v3287_v24 = vmul.f32 0.5, %v3279_v58 }
 0x97f   :  { %v3286_v32 = vmul.f32 0.5, %v3278_v31 }
 0x980   :  { %v3295_v4 = vmul.f32 %v3287_v24, %v3197_v55  ;;  %v3576_v24 = vld [vmem:[%s6148_s7 + $0x8] ss:$0 sm:$0xff] }
 0x981   :  { %v3294_v51 = vmul.f32 %v3286_v32, %v3192_v43 }
 0x983   :  { %v4724_v48 = vpop.eup %4723  ;;  %4137 = vmatprep.mubr.f32.mxu0 %v3294_v51 }
 0x984   :  { %v4726_v46 = vpop.eup %4725  ;;  %4138 = vmatmul.mubr.f32.vlgmr.msra.gmra.mrb[40].mxu0 %v3295_v4  ;;  %v3281_v37 = vadd.f32 1.0, %v4724_v48 }
 0x985   :  { %v3280_v38 = vadd.f32 1.0, %v4726_v46 }
 0x986   :  { %v3289_v0 = vmul.f32 0.5, %v3281_v37 }
 0x987   :  { %v3288_v2 = vmul.f32 0.5, %v3280_v38 }
 0x988   :  { %v3297_v26 = vmul.f32 %v3289_v0, %v3207_v44 }
 0x989   :  { %v3296_v12 = vmul.f32 %v3288_v2, %v3202_v28 }
 0x98b   :  { %4140 = vmatprep.mubr.f32.mxu0 %v3296_v12 }
 0x98c   :  { %4141 = vmatmul.mubr.f32.gmra.mrb[42].mxu0 %v3297_v26 }
 0x99b   :  { %v4101_v39 = vpop.f32.mrb[52].mxu1 }
 0x99c   :  { %v3217_v63 = vadd.f32 %v4101_v39, %v6088_v30  ;;  %v3211_v5 = vpop.f32.mrb[53].mxu1 }
 0x99d   :  { %v3212_v7 = vadd.f32 %v3211_v5, %v6088_v30 }
 0x99e   :  { %v3235_v3 = vmul.f32 %v3217_v63, %v3217_v63 }
 0x99f   :  { %v3234_v61 = vmul.f32 %v3212_v7, %v3212_v7 }
 0x9a0   :  { %v3243_v36 = vmul.f32 %v3235_v3, %v3217_v63 }
 0x9a1   :  { %v3242_v33 = vmul.f32 %v3234_v61, %v3212_v7 }
 0x9a2   :  { %v3251_v34 = vmul.f32 0.044715, %v3243_v36 }
 0x9a3   :  { %v3250_v57 = vmul.f32 0.044715, %v3242_v33  ;;  %v4104_v22 = vpop.f32.mrb[54].mxu1 }
 0x9a4   :  { %v3259_v25 = vadd.f32 %v3251_v34, %v3217_v63  ;;  %v3227_v55 = vadd.f32 %v4104_v22, %v6088_v30  ;;  %v3221_v35 = vpop.f32.mrb[55].mxu1 }
 0x9a5   :  { %v3258_v43 = vadd.f32 %v3250_v57, %v3212_v7  ;;  %v3222_v15 = vadd.f32 %v3221_v35, %v6088_v30 }
 0x9a6   :  { %v3267_v52 = vmul.f32 0.7978846, %v3259_v25  ;;  %v3237_v14 = vmul.f32 %v3227_v55, %v3227_v55 }
 0x9a7   :  { %v3266_v60 = vmul.f32 0.7978846, %v3258_v43  ;;  %v3236_v16 = vmul.f32 %v3222_v15, %v3222_v15 }
 0x9a8   :  { %v3245_v8 = vmul.f32 %v3237_v14, %v3227_v55  ;;  %4727 = vtanh.f32 %v3267_v52 }
 0x9a9   :  { %v3244_v13 = vmul.f32 %v3236_v16, %v3222_v15  ;;  %4729 = vtanh.f32 %v3266_v60 }
 0x9aa   :  { %v3253_v49 = vmul.f32 0.044715, %v3245_v8 }
 0x9ab   :  { %v3252_v44 = vmul.f32 0.044715, %v3244_v13 }
 0x9ac   :  { %v3261_v27 = vadd.f32 %v3253_v49, %v3227_v55 }
 0x9ad   :  { %v3260_v1 = vadd.f32 %v3252_v44, %v3222_v15 }
 0x9ae   :  { %v3269_v28 = vmul.f32 0.7978846, %v3261_v27 }
 0x9af   :  { %v3268_v9 = vmul.f32 0.7978846, %v3260_v1 }
 0x9b0   :  { %4731 = vtanh.f32 %v3269_v28 }
 0x9b1   :  { %4733 = vtanh.f32 %v3268_v9 }
 0x9b2   :  { %v4728_v42 = vpop.eup %4727 }
 0x9b3   :  { %v4730_v10 = vpop.eup %4729  ;;  %v3283_v40 = vadd.f32 1.0, %v4728_v42 }
 0x9b4   :  { %v3282_v30 = vadd.f32 1.0, %v4730_v10 }
 0x9b5   :  { %v3291_v45 = vmul.f32 0.5, %v3283_v40 }
 0x9b6   :  { %v3290_v47 = vmul.f32 0.5, %v3282_v30 }
 0x9b7   :  { %v3299_v17 = vmul.f32 %v3291_v45, %v3217_v63 }
 0x9b8   :  { %v3298_v11 = vmul.f32 %v3290_v47, %v3212_v7 }
 0x9ba   :  { %v4732_v23 = vpop.eup %4731  ;;  %4143 = vmatprep.mubr.f32.mxu0 %v3298_v11 }
 0x9bb   :  { %v4734_v54 = vpop.eup %4733  ;;  %4144 = vmatmul.mubr.f32.gmra.mrb[44].mxu0 %v3299_v17  ;;  %v3285_v50 = vadd.f32 1.0, %v4732_v23 }
 0x9bc   :  { %v3284_v29 = vadd.f32 1.0, %v4734_v54 }
 0x9bd   :  { %v3293_v6 = vmul.f32 0.5, %v3285_v50 }
 0x9be   :  { %v3292_v62 = vmul.f32 0.5, %v3284_v29 }
 0x9bf   :  { %v3301_v31 = vmul.f32 %v3293_v6, %v3227_v55 }
 0x9c0   :  { %v3300_v58 = vmul.f32 %v3292_v62, %v3222_v15 }
 0x9c2   :  { %4146 = vmatprep.mubr.f32.mxu0 %v3300_v58 }
 0x9c3   :  { %4147 = vmatmul.mubr.f32.gmra.mrb[46].mxu0 %v3301_v31 }
 0xa57   :  { %v4139_v32 = vpop.f32.mrb[40].mxu0 }
 0xa58   :  { %v3394_v51 = vadd.f32 %v4139_v32, %v3576_v24  ;;  %v3388_v4 = vpop.f32.mrb[41].mxu0 }
 0xa59   :  { %v3389_v48 = vadd.f32 %v3576_v24, %v3388_v4 }
 0xa5a   :  { %v3428_v46 = vadd.f32 %v3394_v51, %v5935_v21 }
 0xa5b   :  { %v3427_v37 = vadd.f32 %v3389_v48, %v5938_v53 }
 0xa5c   :  { %3436 = vst.msk [vmem:[%s6149_s8 + $0x8] sm:$0xff] %vm199_vm1, %v3428_v46 }
 0xa5d   :  { %3435 = vst.msk [vmem:[%s6149_s8] sm:$0xff] %vm199_vm1, %v3427_v37 }
 0xa5f   :  { %v4142_v38 = vpop.f32.mrb[42].mxu0 }
 0xa60   :  { %v3404_v0 = vadd.f32 %v4142_v38, %v3576_v24  ;;  %v3398_v2 = vpop.f32.mrb[43].mxu0 }
 0xa61   :  { %v3399_v12 = vadd.f32 %v3576_v24, %v3398_v2 }
 0xa62   :  { %v3430_v26 = vadd.f32 %v3404_v0, %v5950_v19 }
 0xa63   :  { %v3429_v21 = vadd.f32 %v3399_v12, %v5957_v20 }
 0xa64   :  { %3438 = vst.msk [vmem:[%s6149_s8 + $0x18] sm:$0xff] %vm199_vm1, %v3430_v26 }
 0xa65   :  { %3437 = vst.msk [vmem:[%s6149_s8 + $0x10] sm:$0xff] %vm199_vm1, %v3429_v21 }
 0xa8e   :  { %v4145_v53 = vpop.f32.mrb[44].mxu0 }
 0xa8f   :  { %v3414_v39 = vadd.f32 %v4145_v53, %v3576_v24  ;;  %v3408_v63 = vpop.f32.mrb[45].mxu0 }
 0xa90   :  { %v3409_v5 = vadd.f32 %v3576_v24, %v3408_v63 }
 0xa91   :  { %v3432_v7 = vadd.f32 %v3414_v39, %v5967_v18 }
 0xa92   :  { %v3431_v19 = vadd.f32 %v3409_v5, %v5970_v59 }
 0xa93   :  { %3440 = vst.msk [vmem:[%s6149_s8 + $0x28] sm:$0xff] %vm199_vm1, %v3432_v7 }
 0xa94   :  { %3439 = vst.msk [vmem:[%s6149_s8 + $0x20] sm:$0xff] %vm199_vm1, %v3431_v19 }
 0xa96   :  { %v4148_v20 = vpop.f32.mrb[46].mxu0 }
 0xa97   :  { %v3424_v3 = vadd.f32 %v4148_v20, %v3576_v24  ;;  %v3418_v61 = vpop.f32.mrb[47].mxu0 }
 0xa98   :  { %v3419_v36 = vadd.f32 %v3576_v24, %v3418_v61 }
 0xa99   :  { %v3434_v33 = vadd.f32 %v3424_v3, %v5982_v56 }
 0xa9a   :  { %v3433_v18 = vadd.f32 %v3419_v36, %v5986_v41 }
 0xa9b   :  { %3442 = vst.msk [vmem:[%s6149_s8 + $0x38] sm:$0xff] %vm199_vm1, %v3434_v33 }
 0xa9c   :  { %3441 = vst.msk [vmem:[%s6149_s8 + $0x30] sm:$0xff] %vm199_vm1, %v3433_v18 }
 0xa9d   :  { %3447 = vsyncpa [#allocation3], 1 }

</bundles_post_ra>
